<compile_context>
chip_gen: v7x
topology: tpu7x:2x2x1
jax: 0.10.0
libtpu: 0.0.40
codegen_flags: <defaults>
</compile_context>

<pallas_src>
import functools

import jax
import jax.numpy as jnp
from jax.experimental import pallas as pl
from jax.experimental.pallas import tpu as pltpu


def _fused_forward_kernel(x_ref, w9_ref, b1_ref, pool_ref, wh_ref, bh_ref,
                          o_ref, *, wp, lc):
    """One block of B images: 3x3 SAME conv + bias + ReLU + GAP + head + sigmoid.

    x_ref   : (B*Lpad, 3C) bf16  dx-packed, zero-padded, row-flattened images
    w9_ref  : (3, 3C, F)   bf16  conv weight, one (3C, F) slab per vertical tap
    b1_ref  : (1, F)       f32   conv bias (zero in padded feature columns)
    pool_ref: (B, Lc)      f32   per-image masked 1/(H*W) pooling rows
    wh_ref  : (F, NC)      bf16  head weight (zero rows for padded features)
    bh_ref  : (1, NC)      f32   head bias
    o_ref   : (B, NC)      f32   sigmoid(head) for the B images of this step
    """
    # 3x3 conv as 3 vertically shifted K=3C matmuls accumulated as a value
    # (chained dot-sums -> MRB-friendly on v7x, no scratch RMW on v5e/v6e).
    acc = jnp.dot(x_ref[0:lc, :], w9_ref[0],
                  preferred_element_type=jnp.float32)
    acc = acc + jnp.dot(x_ref[wp:wp + lc, :], w9_ref[1],
                        preferred_element_type=jnp.float32)
    acc = acc + jnp.dot(x_ref[2 * wp:2 * wp + lc, :], w9_ref[2],
                        preferred_element_type=jnp.float32)

    # Fused bias + ReLU; the (Lc, F) feature tile feeds the GAP matmul directly
    # and is never explicitly stored.
    feats = jnp.maximum(acc + b1_ref[...], 0.0)

    # Global average pool for all B images at once on the MXU: pool_ref row b
    # holds 1/(H*W) at image b's valid pseudo-pixels and 0 everywhere else
    # (padding rows, wrap-around pseudo-pixels, other images' rows).
    pooled = jnp.dot(pool_ref[...], feats,
                     preferred_element_type=jnp.float32)          # (B, F)

    # Head: Linear(num_features, num_classes) + sigmoid with M=B (bf16 MXU dot).
    logits = jnp.dot(pooled.astype(jnp.bfloat16), wh_ref[...],
                     preferred_element_type=jnp.float32) + bh_ref[...]
    o_ref[...] = jax.nn.sigmoid(logits)


def net_forward(x_nchw, params, *, num_classes, block_batch=8):
    w9, b1, wh, bh = params
    n, c, h, w = x_nchw.shape
    f_pad = w9.shape[-1]
    nc_pad = wh.shape[-1]
    wp = w + 2                        # padded row width
    l9 = (h + 2) * wp                 # pseudo-pixel rows the conv reads/image
    l_pad = ((l9 + 7) // 8) * 8       # sublane-align each image's row slab

    # Pick a batch block that divides n and (for v7x's 2 TensorCores) keeps
    # >=2 parallel grid steps whenever possible.
    bb = max(1, min(block_batch, n))
    while n % bb:
        bb -= 1
    if n // bb < 2 and bb > 1:
        bb = max(1, bb // 2)
        while n % bb:
            bb -= 1
    n_steps = n // bb
    lc = bb * l_pad - 2 * wp          # conv output rows computed per grid step

    # Glue (XLA side): NCHW -> NHWC, zero pad (SAME 3x3), flatten rows, fold
    # the 3 horizontal taps into the channel dim (they are consecutive in the
    # flattened row stream), sublane-pad, cast to bf16, group images per step.
    # TODO(synk): for real image sizes fold this into the kernel's input DMA
    # (allow_input_fusion / in-kernel border masking) to avoid the HBM copy.
    x = jnp.transpose(x_nchw, (0, 2, 3, 1))                    # (N, H, W, C)
    x = jnp.pad(x, ((0, 0), (1, 2), (1, 1), (0, 0)))           # (N, H+3, W+2, C)
    x_fr = x.reshape(n, (h + 3) * wp, c)
    x9 = jnp.concatenate([x_fr[:, dx:dx + l9, :] for dx in range(3)], axis=-1)
    x9 = jnp.pad(x9, ((0, 0), (0, l_pad - l9), (0, 0)))
    x9 = x9.astype(jnp.bfloat16).reshape(n_steps, bb * l_pad, 3 * c)

    # Per-step pooling matrix: row b holds 1/(H*W) at image b's valid
    # pseudo-pixels (y < H, x < W) and 0 elsewhere; identical for every step.
    p = jnp.arange(lc)
    img, rem = p // l_pad, p % l_pad
    valid = (rem // wp < h) & (rem % wp < w)
    pool_mat = jnp.where(
        (img[None, :] == jnp.arange(bb)[:, None]) & valid[None, :],
        1.0 / (h * w), 0.0).astype(jnp.float32)                 # (bb, lc)

    kernel = functools.partial(_fused_forward_kernel, wp=wp, lc=lc)

    out = pl.pallas_call(
        kernel,
        out_shape=jax.ShapeDtypeStruct((n_steps, bb, nc_pad), jnp.float32),
        grid=(n_steps,),
        in_specs=[
            pl.BlockSpec((None, bb * l_pad, 3 * c), lambda i: (i, 0, 0)),
            pl.BlockSpec((3, 3 * c, f_pad), lambda i: (0, 0, 0)),
            pl.BlockSpec((1, f_pad), lambda i: (0, 0)),
            pl.BlockSpec((bb, lc), lambda i: (0, 0)),
            pl.BlockSpec((f_pad, nc_pad), lambda i: (0, 0)),
            pl.BlockSpec((1, nc_pad), lambda i: (0, 0)),
        ],
        out_specs=pl.BlockSpec((None, bb, nc_pad), lambda i: (i, 0, 0)),
        compiler_params=pltpu.CompilerParams(
            dimension_semantics=("parallel",)),
    )(x9, w9, b1, pool_mat, wh, bh)

    return out.reshape(n, nc_pad)[:, :num_classes]


def init_params(key, c_in, h, w, num_features, num_classes,
                f_pad=128, nc_pad=128):
    # TODO(synk): when num_features is real-sized, pad F/NC to 256 on v6e/v7x
    # (256-wide MXU) and keep 128 on v5e.
    k1, k2, k3, k4 = jax.random.split(key, 4)
    bound1 = 1.0 / ((9 * c_in) ** 0.5)        # conv stem fan-in
    bound2 = 1.0 / (num_features ** 0.5)      # nn.Linear-style head init

    # Natural-shape parameters (used by the pure-JAX reference).
    w1 = jax.random.uniform(k1, (9, c_in, num_features), jnp.float32,
                            -bound1, bound1)
    b1 = jax.random.uniform(k2, (num_features,), jnp.float32, -bound1, bound1)
    wh = jax.random.uniform(k3, (num_features, num_classes), jnp.float32,
                            -bound2, bound2)
    bh = jax.random.uniform(k4, (num_classes,), jnp.float32, -bound2, bound2)

    # dx-packed conv weight: w9[ky, kx*C + c, f] = w1[ky*3 + kx, c, f],
    # zero-padded to a lane-dense feature width.
    w9 = jnp.zeros((3, 3 * c_in, f_pad), jnp.float32)
    w9 = w9.at[:, :, :num_features].set(
        w1.reshape(3, 3 * c_in, num_features)).astype(jnp.bfloat16)
    b1_p = jnp.zeros((1, f_pad), jnp.float32).at[0, :num_features].set(b1)
    wh_p = jnp.zeros((f_pad, nc_pad), jnp.float32)
    wh_p = wh_p.at[:num_features, :num_classes].set(wh).astype(jnp.bfloat16)
    bh_p = jnp.zeros((1, nc_pad), jnp.float32).at[0, :num_classes].set(bh)

    return (w9, b1_p, wh_p, bh_p), (w1, b1, wh, bh)


def reference_forward(x_nchw, nat_params):
    """Pure-JAX reference with the same bf16 operand rounding as the kernel."""
    w1, b1, wh, bh = nat_params
    x = jnp.transpose(x_nchw, (0, 2, 3, 1))
    x = x.astype(jnp.bfloat16).astype(jnp.float32)
    n, h, w, c = x.shape
    xp = jnp.pad(x, ((0, 0), (1, 1), (1, 1), (0, 0)))
    w1r = w1.astype(jnp.bfloat16).astype(jnp.float32)
    acc = jnp.zeros((n, h, w, w1.shape[-1]), jnp.float32)
    for dy in range(3):
        for dx in range(3):
            xs = xp[:, dy:dy + h, dx:dx + w, :]
            acc = acc + jnp.einsum('nhwc,cf->nhwf', xs, w1r[dy * 3 + dx])
    feats = jnp.maximum(acc + b1, 0.0)
    pooled = feats.mean(axis=(1, 2))
    whr = wh.astype(jnp.bfloat16).astype(jnp.float32)
    return jax.nn.sigmoid(pooled @ whr + bh)


if __name__ == "__main__":
    # Small shapes: batch=4 (2 images per grid step, 2 parallel steps),
    # channels=3, spatial=16x16, num_features=32, num_classes=4.
    N, C, H, W = 4, 3, 16, 16
    NUM_FEATURES, NUM_CLASSES = 32, 4

    key = jax.random.PRNGKey(0)
    kx, kp = jax.random.split(key)
    x = jax.random.normal(kx, (N, C, H, W), jnp.float32)  # NCHW like PyTorch
    params, nat_params = init_params(kp, C, H, W, NUM_FEATURES, NUM_CLASSES)

    fwd = jax.jit(functools.partial(net_forward, num_classes=NUM_CLASSES,
                                    block_batch=2))
    out = jax.block_until_ready(fwd(x, params))

    assert out.shape == (N, NUM_CLASSES)
    assert bool(jnp.all((out >= 0.0) & (out <= 1.0)))   # sigmoid range check
    ref = reference_forward(x, nat_params)
    assert bool(jnp.all(jnp.abs(out - ref) < 2e-2))     # matches reference math
    print("KERNEL_OK")
</pallas_src>

<mosaic_0001>
module attributes {stable_mosaic.version = 11 : i64} {
  func.func @_fused_forward_kernel(%arg0: i32, %arg1: memref<1x656x9xbf16, #tpu.memory_space<vmem>>, %arg2: memref<3x9x128xbf16, #tpu.memory_space<vmem>>, %arg3: memref<1x128xf32, #tpu.memory_space<vmem>>, %arg4: memref<2x620xf32, #tpu.memory_space<vmem>>, %arg5: memref<128x128xbf16, #tpu.memory_space<vmem>>, %arg6: memref<1x128xf32, #tpu.memory_space<vmem>>, %arg7: memref<1x2x128xf32, #tpu.memory_space<vmem>>) attributes {dimension_semantics = [#tpu.dimension_semantics<parallel>], iteration_bounds = array<i64: 2>, scalar_prefetch = 0 : i64, scratch_operands = 0 : i64, tpu.core_type = #tpu.core_type<tc>, window_params = [{transform_indices = @transform_0, window_bounds = array<i64: 1, 656, 9>}, {pipeline_mode = #tpu.pipeline_mode<synchronous>, transform_indices = @transform_1, window_bounds = array<i64: 3, 9, 128>}, {pipeline_mode = #tpu.pipeline_mode<synchronous>, transform_indices = @transform_2, window_bounds = array<i64: 1, 128>}, {pipeline_mode = #tpu.pipeline_mode<synchronous>, transform_indices = @transform_3, window_bounds = array<i64: 2, 620>}, {pipeline_mode = #tpu.pipeline_mode<synchronous>, transform_indices = @transform_4, window_bounds = array<i64: 128, 128>}, {pipeline_mode = #tpu.pipeline_mode<synchronous>, transform_indices = @transform_5, window_bounds = array<i64: 1, 128>}, {transform_indices = @transform_6, window_bounds = array<i64: 1, 2, 128>}]} {
    %c0 = arith.constant 0 : index
    %c0_0 = arith.constant 0 : index
    %c0_1 = arith.constant 0 : index
    %0 = vector.load %arg1[%c0, %c0_0, %c0_1] : memref<1x656x9xbf16, #tpu.memory_space<vmem>>, vector<1x620x9xbf16>
    %1 = vector.shape_cast %0 : vector<1x620x9xbf16> to vector<620x9xbf16>
    %c0_2 = arith.constant 0 : index
    %c0_3 = arith.constant 0 : index
    %c0_4 = arith.constant 0 : index
    %2 = vector.load %arg2[%c0_2, %c0_3, %c0_4] : memref<3x9x128xbf16, #tpu.memory_space<vmem>>, vector<1x9x128xbf16>
    %3 = vector.shape_cast %2 : vector<1x9x128xbf16> to vector<9x128xbf16>
    %cst = arith.constant dense<0.000000e+00> : vector<620x128xf32>
    %4 = tpu.matmul %1, %3, %cst {dimension_numbers = #tpu.dot_dimension_numbers<[1], [0], [0], [1], [0, 0, 1, 1], [], []>} : vector<620x9xbf16>, vector<9x128xbf16>, vector<620x128xf32> -> vector<620x128xf32>
    %c0_5 = arith.constant 0 : index
    %c18 = arith.constant 18 : index
    %c0_6 = arith.constant 0 : index
    %5 = vector.load %arg1[%c0_5, %c18, %c0_6] : memref<1x656x9xbf16, #tpu.memory_space<vmem>>, vector<1x620x9xbf16>
    %6 = vector.shape_cast %5 : vector<1x620x9xbf16> to vector<620x9xbf16>
    %c1 = arith.constant 1 : index
    %c0_7 = arith.constant 0 : index
    %c0_8 = arith.constant 0 : index
    %7 = vector.load %arg2[%c1, %c0_7, %c0_8] : memref<3x9x128xbf16, #tpu.memory_space<vmem>>, vector<1x9x128xbf16>
    %8 = vector.shape_cast %7 : vector<1x9x128xbf16> to vector<9x128xbf16>
    %cst_9 = arith.constant dense<0.000000e+00> : vector<620x128xf32>
    %9 = tpu.matmul %6, %8, %cst_9 {dimension_numbers = #tpu.dot_dimension_numbers<[1], [0], [0], [1], [0, 0, 1, 1], [], []>} : vector<620x9xbf16>, vector<9x128xbf16>, vector<620x128xf32> -> vector<620x128xf32>
    %10 = arith.addf %4, %9 : vector<620x128xf32>
    %c0_10 = arith.constant 0 : index
    %c36 = arith.constant 36 : index
    %c0_11 = arith.constant 0 : index
    %11 = vector.load %arg1[%c0_10, %c36, %c0_11] : memref<1x656x9xbf16, #tpu.memory_space<vmem>>, vector<1x620x9xbf16>
    %12 = vector.shape_cast %11 : vector<1x620x9xbf16> to vector<620x9xbf16>
    %c2 = arith.constant 2 : index
    %c0_12 = arith.constant 0 : index
    %c0_13 = arith.constant 0 : index
    %13 = vector.load %arg2[%c2, %c0_12, %c0_13] : memref<3x9x128xbf16, #tpu.memory_space<vmem>>, vector<1x9x128xbf16>
    %14 = vector.shape_cast %13 : vector<1x9x128xbf16> to vector<9x128xbf16>
    %cst_14 = arith.constant dense<0.000000e+00> : vector<620x128xf32>
    %15 = tpu.matmul %12, %14, %cst_14 {dimension_numbers = #tpu.dot_dimension_numbers<[1], [0], [0], [1], [0, 0, 1, 1], [], []>} : vector<620x9xbf16>, vector<9x128xbf16>, vector<620x128xf32> -> vector<620x128xf32>
    %16 = arith.addf %10, %15 : vector<620x128xf32>
    %c0_15 = arith.constant 0 : index
    %c0_16 = arith.constant 0 : index
    %17 = vector.load %arg3[%c0_15, %c0_16] : memref<1x128xf32, #tpu.memory_space<vmem>>, vector<1x128xf32>
    %18 = vector.broadcast %17 : vector<1x128xf32> to vector<620x128xf32>
    %19 = arith.addf %16, %18 : vector<620x128xf32>
    %cst_17 = arith.constant 0.000000e+00 : f32
    %20 = vector.broadcast %cst_17 : f32 to vector<620x128xf32>
    %21 = arith.maximumf %19, %20 : vector<620x128xf32>
    %c0_18 = arith.constant 0 : index
    %c0_19 = arith.constant 0 : index
    %22 = vector.load %arg4[%c0_18, %c0_19] : memref<2x620xf32, #tpu.memory_space<vmem>>, vector<2x620xf32>
    %cst_20 = arith.constant dense<0.000000e+00> : vector<2x128xf32>
    %23 = tpu.matmul %22, %21, %cst_20 {dimension_numbers = #tpu.dot_dimension_numbers<[1], [0], [0], [1], [0, 0, 1, 1], [], []>} : vector<2x620xf32>, vector<620x128xf32>, vector<2x128xf32> -> vector<2x128xf32>
    %24 = arith.truncf %23 : vector<2x128xf32> to vector<2x128xbf16>
    %c0_21 = arith.constant 0 : index
    %c0_22 = arith.constant 0 : index
    %25 = vector.load %arg5[%c0_21, %c0_22] : memref<128x128xbf16, #tpu.memory_space<vmem>>, vector<128x128xbf16>
    %cst_23 = arith.constant dense<0.000000e+00> : vector<2x128xf32>
    %26 = tpu.matmul %24, %25, %cst_23 {dimension_numbers = #tpu.dot_dimension_numbers<[1], [0], [0], [1], [0, 0, 1, 1], [], []>} : vector<2x128xbf16>, vector<128x128xbf16>, vector<2x128xf32> -> vector<2x128xf32>
    %c0_24 = arith.constant 0 : index
    %c0_25 = arith.constant 0 : index
    %27 = vector.load %arg6[%c0_24, %c0_25] : memref<1x128xf32, #tpu.memory_space<vmem>>, vector<1x128xf32>
    %28 = vector.broadcast %27 : vector<1x128xf32> to vector<2x128xf32>
    %29 = arith.addf %26, %28 : vector<2x128xf32>
    %30 = arith.negf %29 : vector<2x128xf32>
    %31 = math.exp %30 : vector<2x128xf32>
    %cst_26 = arith.constant 1.000000e+00 : f32
    %32 = vector.broadcast %cst_26 : f32 to vector<2x128xf32>
    %33 = arith.addf %32, %31 : vector<2x128xf32>
    %34 = arith.divf %32, %33 : vector<2x128xf32>
    %c0_27 = arith.constant 0 : index
    %c0_28 = arith.constant 0 : index
    %c0_29 = arith.constant 0 : index
    %35 = vector.load %arg7[%c0_27, %c0_28, %c0_29] : memref<1x2x128xf32, #tpu.memory_space<vmem>>, vector<1x2x128xf32>
    %36 = vector.shape_cast %35 : vector<1x2x128xf32> to vector<2x128xf32>
    %37 = vector.shape_cast %34 : vector<2x128xf32> to vector<1x2x128xf32>
    tpu.vector_store %arg7[%c0_27, %c0_28, %c0_29], %37 {strides = array<i32>} : memref<1x2x128xf32, #tpu.memory_space<vmem>>, vector<1x2x128xf32>,
    return
  }
  func.func @transform_0(%arg0: i32) -> (i32, i32, i32) {
    %c0_i32 = arith.constant 0 : i32
    %c0_i32_0 = arith.constant 0 : i32
    %c0_i32_1 = arith.constant 0 : i32
    return %arg0, %c0_i32, %c0_i32_0 : i32, i32, i32
  }
  func.func @transform_1(%arg0: i32) -> (i32, i32, i32) {
    %c0_i32 = arith.constant 0 : i32
    %c0_i32_0 = arith.constant 0 : i32
    %c0_i32_1 = arith.constant 0 : i32
    %c0_i32_2 = arith.constant 0 : i32
    return %c0_i32, %c0_i32_0, %c0_i32_1 : i32, i32, i32
  }
  func.func @transform_2(%arg0: i32) -> (i32, i32) {
    %c0_i32 = arith.constant 0 : i32
    %c0_i32_0 = arith.constant 0 : i32
    %c0_i32_1 = arith.constant 0 : i32
    return %c0_i32, %c0_i32_0 : i32, i32
  }
  func.func @transform_3(%arg0: i32) -> (i32, i32) {
    %c0_i32 = arith.constant 0 : i32
    %c0_i32_0 = arith.constant 0 : i32
    %c0_i32_1 = arith.constant 0 : i32
    return %c0_i32, %c0_i32_0 : i32, i32
  }
  func.func @transform_4(%arg0: i32) -> (i32, i32) {
    %c0_i32 = arith.constant 0 : i32
    %c0_i32_0 = arith.constant 0 : i32
    %c0_i32_1 = arith.constant 0 : i32
    return %c0_i32, %c0_i32_0 : i32, i32
  }
  func.func @transform_5(%arg0: i32) -> (i32, i32) {
    %c0_i32 = arith.constant 0 : i32
    %c0_i32_0 = arith.constant 0 : i32
    %c0_i32_1 = arith.constant 0 : i32
    return %c0_i32, %c0_i32_0 : i32, i32
  }
  func.func @transform_6(%arg0: i32) -> (i32, i32, i32) {
    %c0_i32 = arith.constant 0 : i32
    %c0_i32_0 = arith.constant 0 : i32
    %c0_i32_1 = arith.constant 0 : i32
    return %arg0, %c0_i32, %c0_i32_0 : i32, i32, i32
  }
}

</mosaic_0001>

<bundles_post_ra>
// kernel: net_forward.1
= control target key start
LH: loop header
LB: loop body
LE: loop exit
PB: predicated region body
PF: predicated region fallthrough
CT: control target
= control target key end

     0   :  { %11 = vsyncpa [#allocation3], 0  ;;  %s5815_s0 = inlined_call_operand.vmem [shape: bf16[2,656,9], index: 0, kind: input, shape index: {}]   ;;  %s5816_s1 = inlined_call_operand.vmem [shape: bf16[3,9,128], index: 1, kind: input, shape index: {}]   ;;  %s5817_s2 = inlined_call_operand.vmem [shape: f32[1,128], index: 2, kind: input, shape index: {}]   ;;  %s5818_s3 = inlined_call_operand.vmem [shape: f32[2,620], index: 3, kind: input, shape index: {}]   ;;  %s5819_s4 = inlined_call_operand.vmem [shape: bf16[128,128], index: 4, kind: input, shape index: {}]   ;;  %s5820_s5 = inlined_call_operand.vmem [shape: f32[1,128], index: 5, kind: input, shape index: {}]   ;;  %s5821_s6 = inlined_call_operand.hbm [shape: f32[2,2,128], index: 6, kind: output, shape index: {}]  }
   0x1   :  { %13 = vsyncpa [#allocation3 + $0x1], 0  ;;  %s4390_s21 = smov 0   ;;  %s4392_s22 = smov 0  }
   0x2   :  { %s4394_s23 = smov 0   ;;  %s4396_s24 = smov 0  }
   0x3 LB: > { %s4411_s25 = sadd.s32 4294967295, %s4346_s24   ;;  %s3072_s26 = sadd.s32 4294967294, %s4346_s24   ;;  %s4346_s24 = sphi %s4396_s24, %s5896_s24   ;;  %s4342_s23 = sphi %s4394_s23, %s5895_s23   ;;  %s4338_s22 = sphi %s4392_s22, %s5894_s22   ;;  %s4334_s21 = sphi %s4390_s21, %s5893_s21  }
   0x4   : > { %s4415_s27 = sadd.s32 1, %s4346_s24   ;;  %s157_s28 = sadd.s32 1, %s4342_s23 }
   0x5   : > { %s154_s29 = ssub.s32 %s4346_s24, %s4415_s27  ;;  %p167_p0 = scmp.ne.s32.totalorder %s4342_s23, %s4338_s22 }
   0x6   : > { %p155_p1 = scmp.eq.s32.totalorder %s154_s29, 0  ;;  %p168_p2 = scmp.eq.s32.totalorder %s4411_s25, 1 }
   0x7   : > { %p173_p3 = scmp.ne.s32.totalorder %s4338_s22, %s4334_s21  ;;  %p174_p4 = scmp.eq.s32.totalorder %s3072_s26, 1 }
   0x8   : > { %s4426_s30 = scalar_select %p155_p1, %s4342_s23, %s157_s28  }
   0x9   : > { %p4428_p5 = por %p168_p2, %p167_p0  ;;  %p4432_p6 = por %p174_p4, %p173_p3 }
   0xa   : > { %p3075_p7 = scmp.ge.s32.totalorder %s4346_s24, 1  ;;  %p215_p8 = scmp.lt.s32.totalorder %s4346_s24, 3 }
   0xc   : > { %p216_p9 = pnand %p3075_p7, %p215_p8 }
   0xe   : > { %219 = sbr.rel (%p216_p9) target bundleno = 1242 (0x4da), region = 44 }
  0x15   : > { %vm734_vm0 = vcmask 1043456   ;;  %v5822_v0 = vmov 0.0   ;;  %v4174_v1 = vld [vmem:[%s5816_s1 + $0x8] sm:$0x1f]   ;;  %vm735_vm1 = vcmask 1044480   ;;  %v4349_v2 = vmov 65535  }
  0x16   : > { %3515 = vmatprep.subr.bf16.mxu0 %v5822_v0  ;;  %4126 = vmatprep.subr.bf16.mxu1 %v5822_v0  ;;  %v736_v3 = vsel %vm734_vm0, 4294967295, %v4349_v2  ;;  %vm4350_vm2 = vmmov 0   ;;  %p245_p10 = scmp.lt.s32.totalorder %s4411_s25, 1  ;;  %v4175_v6 = vld [vmem:[%s5816_s1] sm:$0x1f]   ;;  %vm533_vm3 = vcmask 1046528  }
  0x17   : > { %v737_v4 = vsel %vm735_vm1, %v736_v3, 0  ;;  %3517 = vmatprep.mubr.msk.bf16.mxu0 %vm4350_vm2, %v5822_v0  ;;  %3621 = vmatprep.mubr.msk.bf16.mxu1 %vm4350_vm2, %v5822_v0  ;;  %v4176_v7 = vld [vmem:[%s5816_s1 + $0x10] sm:$0x1f]   ;;  %vm616_vm4 = vcmask 72704   ;;  %vm1843_vm5 = vcmask 1045504   ;;  %vm4353_vm6 = vmmov 1  }
  0x18   : > { %v739_v5 = vand.u32 %v4174_v1, %v737_v4  ;;  %s246_s11 = scalar_select %p245_p10, %s4411_s25, 1  ;;  %v1220_v17 = vand.u32 %v4175_v6, %v737_v4  ;;  %v2044_v21 = vand.u32 %v4176_v7, %v737_v4  ;;  %vm4124_vm7 = vmpackc.low %vm734_vm0, %vm4353_vm6  ;;  %vm2664_vm8 = vcmask 883712  }
  0x19   : > { %s242_s16 = sand.u32 1, %s4338_s22   ;;  %s3298_s18 = sshll.u32 %s4411_s25, 5 }
  0x1a   : > { %3516 = vmatpush3.bf16.msra.mxu0 %v739_v5  ;;  %4127 = vmatpush3.bf16.msra.mxu1 %v739_v5  ;;  %s4128_s12 = smul.u32 328, %s246_s11  ;;  %s5773_s29 = scalar_lea.hbm %s5821_s6, %s3298_s18 }
  0x1b   : > { %3673 = vmatprep.subr.bf16.mxu1 %v5822_v0  ;;  %3831 = vmatprep.subr.bf16.mxu0 %v5822_v0  ;;  %s3000_s9 = scalar_lea.sflag [#allocation3], %s242_s16  ;;  %s4354_s25 = smov [#allocation2]  }
  0x1c   : > { %s4458_s17 = scalar_lea.vmem %s5815_s0, %s4128_s12  ;;  %s4288_s11 = sshll.u32 %s4354_s25, 4  ;;  %s4289_s11 = int_to_ptr.vmem [resolvable:$false] %s4288_s11 }
  0x1d   : > { %v4464_v8 = vld [vmem:[%s4458_s17 + $0xc] sm:$0xf]  ;;  %v331_v9 = vld [vmem:[%s4458_s17 + $0x8] sm:$0xe]  ;;  %v4468_v10 = vld [vmem:[%s4458_s17 + $0x10] sm:$0xff]   ;;  %s4290_s12 = scalar_lea.vmem %s4289_s11, 64 }
  0x1e   : > { %v3080_v11 = vcombine.low %v331_v9, %v4464_v8  ;;  %v535_v12 = vrot.slane %v4468_v10, 1  ;;  %v4473_v13 = vld [vmem:[%s4458_s17 + $0xd8] sm:$0xff]   ;;  %v4180_v14 = vld [vmem:[%s4458_s17 + $0xe0] sm:$0xff]   ;;  %v4182_v20 = vld [vmem:[%s4458_s17 + $0xe8] sm:$0xff]  }
  0x1f   : > { %v4477_v16 = vld [vmem:[%s4458_s17 + $0x18] sm:$0xff]   ;;  %v585_v18 = vrot.slane %v4473_v13, 1  ;;  %v587_v19 = vrot.slane %v4180_v14, 1  ;;  %v589_v25 = vrot.slane %v4182_v20, 1  ;;  %v4494_v27 = vld [vmem:[%s4458_s17 + $0x20] sm:$0xff]   ;;  %v4184_v29 = vld [vmem:[%s4458_s17 + $0xf0] sm:$0xff]  }
  0x20   : > { %v534_v15 = vrot.slane %v3080_v11, 1  ;;  %v537_v24 = vrot.slane %v4477_v16, 1  ;;  %v539_v30 = vrot.slane %v4494_v27, 1  ;;  %v591_v31 = vrot.slane %v4184_v29, 1  ;;  %v4507_v33 = vld [vmem:[%s4458_s17 + $0x28] sm:$0xff]   ;;  %v4186_v35 = vld [vmem:[%s4458_s17 + $0xf8] sm:$0xff]  }
  0x21   : > { %v588_v23 = vsel %vm533_vm3, %v585_v18, %v587_v19  ;;  %v590_v28 = vsel %vm533_vm3, %v587_v19, %v589_v25  ;;  %v541_v36 = vrot.slane %v4507_v33, 1  ;;  %v593_v37 = vrot.slane %v4186_v35, 1  ;;  %v4520_v39 = vld [vmem:[%s4458_s17 + $0x30] sm:$0xff]   ;;  %v4188_v41 = vld [vmem:[%s4458_s17 + $0x100] sm:$0xff]   ;;  %v4532_v44 = vld [vmem:[%s4458_s17 + $0x38] sm:$0xff]  }
  0x22   : > { %v536_v22 = vsel %vm533_vm3, %v534_v15, %v535_v12  ;;  %3622 = vmatmul.mubr.msk.bf16.vlgmr.msra.gmra.mrb[0].mxu1 %vm616_vm4, %v588_v23  ;;  %v538_v26 = vsel %vm533_vm3, %v535_v12, %v537_v24  ;;  %v540_v32 = vsel %vm533_vm3, %v537_v24, %v539_v30  ;;  %v592_v34 = vsel %vm533_vm3, %v589_v25, %v591_v31  ;;  %v4190_v47 = vld [vmem:[%s4458_s17 + $0x108] sm:$0xff]   ;;  %v4539_v49 = vld [vmem:[%s4458_s17 + $0x40] sm:$0xff]   ;;  %v4192_v52 = vld [vmem:[%s4458_s17 + $0x110] sm:$0xff]  }
  0x23   : > { %3518 = vmatmul.mubr.msk.bf16.vlgmr.msra.gmra.mrb[0].mxu0 %vm616_vm4, %v536_v22  ;;  %3625 = vmatprep.mubr.msk.bf16.mxu1 %vm4350_vm2, %v5822_v0  ;;  %v542_v38 = vsel %vm533_vm3, %v539_v30, %v541_v36  ;;  %v594_v40 = vsel %vm533_vm3, %v591_v31, %v593_v37  ;;  %v543_v42 = vrot.slane %v4520_v39, 1  ;;  %v595_v43 = vrot.slane %v4188_v41, 1  ;;  %v4552_v55 = vld [vmem:[%s4458_s17 + $0x48] sm:$0xff]   ;;  %v4194_v58 = vld [vmem:[%s4458_s17 + $0x118] sm:$0xff]   ;;  %v4565_v61 = vld [vmem:[%s4458_s17 + $0x50] sm:$0xff]  }
  0x24   : > { %3521 = vmatprep.mubr.msk.bf16.mxu0 %vm4350_vm2, %v5822_v0  ;;  %3674 = vmatpush3.bf16.msra.mxu1 %v1220_v17  ;;  %v545_v48 = vrot.slane %v4532_v44, 1  ;;  %v597_v50 = vrot.slane %v4190_v47, 1  ;;  %v547_v51 = vrot.slane %v4539_v49, 1  ;;  %v599_v56 = vrot.slane %v4192_v52, 1  ;;  %v4196_v1 = vld [vmem:[%s4458_s17 + $0x120] sm:$0xff]   ;;  %v4585_v6 = vld [vmem:[%s4458_s17 + $0x58] sm:$0xff]  }
  0x25   : > { %3832 = vmatpush3.bf16.msra.mxu0 %v2044_v21  ;;  %v544_v45 = vsel %vm533_vm3, %v541_v36, %v543_v42  ;;  %v596_v46 = vsel %vm533_vm3, %v593_v37, %v595_v43  ;;  %v549_v57 = vrot.slane %v4552_v55, 1  ;;  %v601_v62 = vrot.slane %v4194_v58, 1  ;;  %v4198_v9 = vld [vmem:[%s4458_s17 + $0x128] sm:$0xff]   ;;  %v327_v14 = vld [vmem:[%s4458_s17 + $0x130] sm:$0xf]  ;;  %v4600_v19 = vld [vmem:[%s4458_s17 + $0x60] sm:$0xff]  }
  0x26   : > { %v546_v53 = vsel %vm533_vm3, %v543_v42, %v545_v48  ;;  %v598_v54 = vsel %vm533_vm3, %v595_v43, %v597_v50  ;;  %v548_v59 = vsel %vm533_vm3, %v545_v48, %v547_v51  ;;  %v600_v60 = vsel %vm533_vm3, %v597_v50, %v599_v56  ;;  %v332_v15 = vld [vmem:[%s4458_s17 + $0x134] sm:$0xf]  ;;  %v4612_v25 = vld [vmem:[%s4458_s17 + $0x68] sm:$0xff]   ;;  %v4637_v37 = vld [vmem:[%s4458_s17 + $0x78] sm:$0xff]  }
  0x27   : > { %v551_v63 = vrot.slane %v4565_v61, 1  ;;  %v550_v2 = vsel %vm533_vm3, %v547_v51, %v549_v57  ;;  %v602_v3 = vsel %vm533_vm3, %v599_v56, %v601_v62  ;;  %v603_v4 = vrot.slane %v4196_v1, 1  ;;  %v4205_v41 = vld [vmem:[%s4458_s17] sm:$0xff]   ;;  %v4662_v48 = vld [vmem:[%s4458_s17 + $0x88] sm:$0xff]   ;;  %v4673_v52 = vld [vmem:[%s4458_s17 + $0x90] sm:$0xff]  }
  0x28   : > { %v553_v11 = vrot.slane %v4585_v6, 1  ;;  %v605_v12 = vrot.slane %v4198_v9, 1  ;;  %v3117_v21 = vcombine.low %v327_v14, %v332_v15  ;;  %v555_v22 = vrot.slane %v4600_v19, 1  ;;  %v4649_v42 = vld [vmem:[%s4458_s17 + $0x80] sm:$0xff]   ;;  %v4733_v1 = vld [vmem:[%s4458_s17 + $0xb8] sm:$0xff]   ;;  %v4769_v9 = vld [vmem:[%s4458_s17 + $0xd0] sm:$0xff]  }
  0x29   : > { %v552_v5 = vsel %vm533_vm3, %v549_v57, %v551_v63  ;;  %v604_v7 = vsel %vm533_vm3, %v601_v62, %v603_v4  ;;  %v557_v29 = vrot.slane %v4612_v25, 1  ;;  %v563_v43 = vrot.slane %v4649_v42, 1  ;;  %v4697_v57 = vld [vmem:[%s4458_s17 + $0xa0] sm:$0xff]   ;;  %v4721_v62 = vld [vmem:[%s4458_s17 + $0xb0] sm:$0xff]   ;;  %v4219_v14 = vld [vmem:[%s4458_s17 + $0x18] sm:$0xff]  }
  0x2a   : > { %3626 = vmatmul.mubr.msk.bf16.gmra.mrb[4].mxu1 %vm616_vm4, %v590_v28  ;;  %v554_v17 = vsel %vm533_vm3, %v551_v63, %v553_v11  ;;  %v606_v20 = vsel %vm533_vm3, %v603_v4, %v605_v12  ;;  %v607_v23 = vrot.slane %v3117_v21, 1  ;;  %v556_v24 = vsel %vm533_vm3, %v553_v11, %v555_v22  ;;  %v4202_v28 = vld [vmem:[%s4458_s17 + $0x138] sm:$0x7f]  }
  0x2b   : > { %3522 = vmatmul.mubr.msk.bf16.gmra.mrb[4].mxu0 %vm616_vm4, %v538_v26  ;;  %3629 = vmatprep.mubr.msk.bf16.mxu1 %vm4350_vm2, %v5822_v0  ;;  %v609_v30 = vrot.slane %v4202_v28, 1  ;;  %v558_v31 = vsel %vm533_vm3, %v555_v22, %v557_v29  ;;  %v565_v50 = vrot.slane %v4662_v48, 1  ;;  %v1845_v15 = vrot.slane %v4219_v14, 2 }
  0x2c   : > { %3525 = vmatprep.mubr.msk.bf16.mxu0 %vm4350_vm2, %v5822_v0  ;;  %v608_v26 = vsel %vm533_vm3, %v605_v12, %v607_v23  ;;  %v4218_v12 = vld [vmem:[%s4458_s17 + $0x10] sm:$0xfc]  }
  0x2d   : > { %v566_v51 = vsel %vm533_vm3, %v563_v43, %v565_v50 }
  0x32   : > { %3630 = vmatmul.mubr.msk.bf16.gmra.mrb[8].mxu1 %vm616_vm4, %v592_v34  ;;  %v610_v34 = vsel %vm533_vm3, %v607_v23, %v609_v30 }
  0x33   : > { %3526 = vmatmul.mubr.msk.bf16.gmra.mrb[8].mxu0 %vm616_vm4, %v540_v32  ;;  %3633 = vmatprep.mubr.msk.bf16.mxu1 %vm4350_vm2, %v5822_v0  ;;  %v4625_v32 = vld [vmem:[%s4458_s17 + $0x70] sm:$0xff]  }
  0x34   : > { %3529 = vmatprep.mubr.msk.bf16.mxu0 %vm4350_vm2, %v5822_v0  ;;  %v559_v35 = vrot.slane %v4625_v32, 1 }
  0x36   : > { %v560_v36 = vsel %vm533_vm3, %v557_v29, %v559_v35 }
  0x3a   : > { %3634 = vmatmul.mubr.msk.bf16.gmra.mrb[12].mxu1 %vm616_vm4, %v594_v40 }
  0x3b   : > { %3530 = vmatmul.mubr.msk.bf16.gmra.mrb[12].mxu0 %vm616_vm4, %v542_v38  ;;  %3637 = vmatprep.mubr.msk.bf16.mxu1 %vm4350_vm2, %v5822_v0  ;;  %v561_v38 = vrot.slane %v4637_v37, 1 }
  0x3c   : > { %3533 = vmatprep.mubr.msk.bf16.mxu0 %vm4350_vm2, %v5822_v0 }
  0x3d   : > { %v562_v40 = vsel %vm533_vm3, %v559_v35, %v561_v38 }
  0x42   : > { %3638 = vmatmul.mubr.msk.bf16.gmra.mrb[16].mxu1 %vm616_vm4, %v596_v46  ;;  %v564_v46 = vsel %vm533_vm3, %v561_v38, %v563_v43 }
  0x43   : > { %3534 = vmatmul.mubr.msk.bf16.gmra.mrb[16].mxu0 %vm616_vm4, %v544_v45  ;;  %3641 = vmatprep.mubr.msk.bf16.mxu1 %vm4350_vm2, %v5822_v0  ;;  %v253_v45 = vld [vmem:[%s4458_s17 + $0x8] sm:$0xf] }
  0x44   : > { %3537 = vmatprep.mubr.msk.bf16.mxu0 %vm4350_vm2, %v5822_v0  ;;  %v3160_v47 = vcombine.low %v253_v45, %v4464_v8  ;;  %v567_v8 = vrot.slane %v4673_v52, 1 }
  0x4a   : > { %3642 = vmatmul.mubr.msk.bf16.gmra.mrb[20].mxu1 %vm616_vm4, %v598_v54  ;;  %v4685_v54 = vld [vmem:[%s4458_s17 + $0x98] sm:$0xff]  }
  0x4b   : > { %3538 = vmatmul.mubr.msk.bf16.gmra.mrb[20].mxu0 %vm616_vm4, %v546_v53  ;;  %3645 = vmatprep.mubr.msk.bf16.mxu1 %vm4350_vm2, %v5822_v0  ;;  %v568_v53 = vsel %vm533_vm3, %v565_v50, %v567_v8 }
  0x4c   : > { %3541 = vmatprep.mubr.msk.bf16.mxu0 %vm4350_vm2, %v5822_v0 }
  0x52   : > { %3646 = vmatmul.mubr.msk.bf16.gmra.mrb[24].mxu1 %vm616_vm4, %v600_v60 }
  0x53   : > { %3542 = vmatmul.mubr.msk.bf16.gmra.mrb[24].mxu0 %vm616_vm4, %v548_v59  ;;  %3649 = vmatprep.mubr.msk.bf16.mxu1 %vm4350_vm2, %v5822_v0  ;;  %v4709_v59 = vld [vmem:[%s4458_s17 + $0xa8] sm:$0xff]  }
  0x54   : > { %3545 = vmatprep.mubr.msk.bf16.mxu0 %vm4350_vm2, %v5822_v0 }
  0x5a   : > { %3650 = vmatmul.mubr.msk.bf16.gmra.mrb[28].mxu1 %vm616_vm4, %v602_v3  ;;  %v4745_v3 = vld [vmem:[%s4458_s17 + $0xc0] sm:$0xff]  }
  0x5b   : > { %3546 = vmatmul.mubr.msk.bf16.gmra.mrb[28].mxu0 %vm616_vm4, %v550_v2  ;;  %3653 = vmatprep.mubr.msk.bf16.mxu1 %vm4350_vm2, %v5822_v0 }
  0x5c   : > { %3549 = vmatprep.mubr.msk.bf16.mxu0 %vm4350_vm2, %v5822_v0 }
  0x62   : > { %3654 = vmatmul.mubr.msk.bf16.gmra.mrb[32].mxu1 %vm616_vm4, %v604_v7 }
  0x63   : > { %3550 = vmatmul.mubr.msk.bf16.gmra.mrb[32].mxu0 %vm616_vm4, %v552_v5  ;;  %3657 = vmatprep.mubr.msk.bf16.mxu1 %vm4350_vm2, %v5822_v0  ;;  %v4757_v5 = vld [vmem:[%s4458_s17 + $0xc8] sm:$0xff]  }
  0x64   : > { %3553 = vmatprep.mubr.msk.bf16.mxu0 %vm4350_vm2, %v5822_v0 }
  0x6a   : > { %3658 = vmatmul.mubr.msk.bf16.gmra.mrb[36].mxu1 %vm616_vm4, %v606_v20 }
  0x6b   : > { %3554 = vmatmul.mubr.msk.bf16.gmra.mrb[36].mxu0 %vm616_vm4, %v554_v17  ;;  %3661 = vmatprep.mubr.msk.bf16.mxu1 %vm4350_vm2, %v5822_v0 }
  0x6c   : > { %3557 = vmatprep.mubr.msk.bf16.mxu0 %vm4350_vm2, %v5822_v0 }
  0x72   : > { %3662 = vmatmul.mubr.msk.bf16.gmra.mrb[40].mxu1 %vm616_vm4, %v608_v26 }
  0x73   : > { %3558 = vmatmul.mubr.msk.bf16.gmra.mrb[40].mxu0 %vm616_vm4, %v556_v24  ;;  %3665 = vmatprep.mubr.msk.bf16.mxu1 %vm4350_vm2, %v5822_v0  ;;  %v4221_v24 = vld [vmem:[%s4458_s17 + $0x28] sm:$0xff]  }
  0x74   : > { %3561 = vmatprep.mubr.msk.bf16.mxu0 %vm4350_vm2, %v5822_v0 }
  0x7a   : > { %3666 = vmatmul.mubr.msk.bf16.gmra.mrb[44].mxu1 %vm616_vm4, %v610_v34 }
  0x7b   : > { %3562 = vmatmul.mubr.msk.bf16.gmra.mrb[44].mxu0 %vm616_vm4, %v558_v31  ;;  %3669 = vmatprep.mubr.msk.bf16.mxu1 %vm4350_vm2, %v5822_v0 }
  0x7c   : > { %3565 = vmatprep.mubr.msk.bf16.mxu0 %vm4350_vm2, %v5822_v0 }
  0x82   : > { %3670 = vmatmul.mubr.msk.bf16.gmra.mrb[48].mxu1 %vm616_vm4, %v609_v30  ;;  %v1849_v30 = vrot.slane %v4221_v24, 2 }
  0x83   : > { %3566 = vmatmul.mubr.msk.bf16.gmra.mrb[48].mxu0 %vm616_vm4, %v560_v36  ;;  %3675 = vmatprep.mubr.msk.bf16.mxu1 %vm4350_vm2, %v5822_v0 }
  0x84   : > { %3569 = vmatprep.mubr.msk.bf16.mxu0 %vm4350_vm2, %v5822_v0 }
  0x8a   : > { %3676 = vmatmul.mubr.msk.bf16.vlgmr.msra.gmra.mrb[52].mxu1 %vm616_vm4, %v4205_v41 }
  0x8b   : > { %3570 = vmatmul.mubr.msk.bf16.gmra.mrb[52].mxu0 %vm616_vm4, %v562_v40  ;;  %3679 = vmatprep.mubr.msk.bf16.mxu1 %vm4350_vm2, %v5822_v0  ;;  %v4222_v40 = vld [vmem:[%s4458_s17 + $0x30] sm:$0xff]  }
  0x8c   : > { %3573 = vmatprep.mubr.msk.bf16.mxu0 %vm4350_vm2, %v5822_v0 }
  0x92   : > { %3680 = vmatmul.mubr.msk.bf16.gmra.mrb[56].mxu1 %vm616_vm4, %v3160_v47 }
  0x93   : > { %3574 = vmatmul.mubr.msk.bf16.gmra.mrb[56].mxu0 %vm616_vm4, %v564_v46  ;;  %3683 = vmatprep.mubr.msk.bf16.mxu1 %vm4350_vm2, %v5822_v0  ;;  %v1851_v46 = vrot.slane %v4222_v40, 2 }
  0x94   : > { %3577 = vmatprep.mubr.msk.bf16.mxu0 %vm4350_vm2, %v5822_v0 }
  0x9a   : > { %3684 = vmatmul.mubr.msk.bf16.gmra.mrb[60].mxu1 %vm616_vm4, %v4468_v10  ;;  %v569_v10 = vrot.slane %v4685_v54, 1 }
  0x9b   : > { %3578 = vmatmul.mubr.msk.bf16.gmra.mrb[60].mxu0 %vm616_vm4, %v566_v51  ;;  %3687 = vmatprep.mubr.msk.bf16.mxu1 %vm4350_vm2, %v5822_v0 }
  0x9c   : > { %3581 = vmatprep.mubr.msk.bf16.mxu0 %vm4350_vm2, %v5822_v0  ;;  %v570_v56 = vsel %vm533_vm3, %v567_v8, %v569_v10 }
  0xa2   : > { %3688 = vmatmul.mubr.msk.bf16.gmra.mrb[64].mxu1 %vm616_vm4, %v4477_v16  ;;  %v571_v16 = vrot.slane %v4697_v57, 1 }
  0xa3   : > { %3582 = vmatmul.mubr.msk.bf16.gmra.mrb[64].mxu0 %vm616_vm4, %v568_v53  ;;  %3691 = vmatprep.mubr.msk.bf16.mxu1 %vm4350_vm2, %v5822_v0  ;;  %v1852_v53 = vsel %vm1843_vm5, %v1849_v30, %v1851_v46 }
  0xa4   : > { %3585 = vmatprep.mubr.msk.bf16.mxu0 %vm4350_vm2, %v5822_v0  ;;  %v572_v58 = vsel %vm533_vm3, %v569_v10, %v571_v16  ;;  %v4223_v10 = vld [vmem:[%s4458_s17 + $0x38] sm:$0xff]  }
  0xaa   : > { %3692 = vmatmul.mubr.msk.bf16.gmra.mrb[68].mxu1 %vm616_vm4, %v4494_v27  ;;  %v573_v27 = vrot.slane %v4709_v59, 1 }
  0xab   : > { %3586 = vmatmul.mubr.msk.bf16.gmra.mrb[68].mxu0 %vm616_vm4, %v570_v56  ;;  %3695 = vmatprep.mubr.msk.bf16.mxu1 %vm4350_vm2, %v5822_v0 }
  0xac   : > { %3589 = vmatprep.mubr.msk.bf16.mxu0 %vm4350_vm2, %v5822_v0  ;;  %v574_v60 = vsel %vm533_vm3, %v571_v16, %v573_v27 }
  0xb2   : > { %3696 = vmatmul.mubr.msk.bf16.gmra.mrb[72].mxu1 %vm616_vm4, %v4507_v33  ;;  %v575_v33 = vrot.slane %v4721_v62, 1 }
  0xb3   : > { %3590 = vmatmul.mubr.msk.bf16.gmra.mrb[72].mxu0 %vm616_vm4, %v572_v58  ;;  %3699 = vmatprep.mubr.msk.bf16.mxu1 %vm4350_vm2, %v5822_v0 }
  0xb4   : > { %3593 = vmatprep.mubr.msk.bf16.mxu0 %vm4350_vm2, %v5822_v0  ;;  %v576_v63 = vsel %vm533_vm3, %v573_v27, %v575_v33  ;;  %v1853_v27 = vrot.slane %v4223_v10, 2  ;;  %v4227_v10 = vld [vmem:[%s4458_s17 + $0x58] sm:$0xff]  }
  0xba   : > { %3700 = vmatmul.mubr.msk.bf16.gmra.mrb[76].mxu1 %vm616_vm4, %v4520_v39  ;;  %v577_v39 = vrot.slane %v4733_v1, 1 }
  0xbb   : > { %3594 = vmatmul.mubr.msk.bf16.gmra.mrb[76].mxu0 %vm616_vm4, %v574_v60  ;;  %3703 = vmatprep.mubr.msk.bf16.mxu1 %vm4350_vm2, %v5822_v0 }
  0xbc   : > { %3597 = vmatprep.mubr.msk.bf16.mxu0 %vm4350_vm2, %v5822_v0  ;;  %v578_v2 = vsel %vm533_vm3, %v575_v33, %v577_v39 }
  0xc2   : > { %3704 = vmatmul.mubr.msk.bf16.gmra.mrb[80].mxu1 %vm616_vm4, %v4532_v44  ;;  %v579_v44 = vrot.slane %v4745_v3, 1 }
  0xc3   : > { %3598 = vmatmul.mubr.msk.bf16.gmra.mrb[80].mxu0 %vm616_vm4, %v576_v63  ;;  %3707 = vmatprep.mubr.msk.bf16.mxu1 %vm4350_vm2, %v5822_v0 }
  0xc4   : > { %3601 = vmatprep.mubr.msk.bf16.mxu0 %vm4350_vm2, %v5822_v0  ;;  %v580_v4 = vsel %vm533_vm3, %v577_v39, %v579_v44 }
  0xca   : > { %3708 = vmatmul.mubr.msk.bf16.gmra.mrb[84].mxu1 %vm616_vm4, %v4539_v49  ;;  %v581_v49 = vrot.slane %v4757_v5, 1 }
  0xcb   : > { %3602 = vmatmul.mubr.msk.bf16.gmra.mrb[84].mxu0 %vm616_vm4, %v578_v2  ;;  %3711 = vmatprep.mubr.msk.bf16.mxu1 %vm4350_vm2, %v5822_v0  ;;  %v1854_v2 = vsel %vm1843_vm5, %v1851_v46, %v1853_v27 }
  0xcc   : > { %3605 = vmatprep.mubr.msk.bf16.mxu0 %vm4350_vm2, %v5822_v0  ;;  %v582_v7 = vsel %vm533_vm3, %v579_v44, %v581_v49  ;;  %v4224_v44 = vld [vmem:[%s4458_s17 + $0x40] sm:$0xff]  }
  0xd2   : > { %3712 = vmatmul.mubr.msk.bf16.gmra.mrb[88].mxu1 %vm616_vm4, %v4552_v55  ;;  %v583_v55 = vrot.slane %v4769_v9, 1 }
  0xd3   : > { %3606 = vmatmul.mubr.msk.bf16.gmra.mrb[88].mxu0 %vm616_vm4, %v580_v4  ;;  %3715 = vmatprep.mubr.msk.bf16.mxu1 %vm4350_vm2, %v5822_v0 }
  0xd4   : > { %3609 = vmatprep.mubr.msk.bf16.mxu0 %vm4350_vm2, %v5822_v0  ;;  %v584_v11 = vsel %vm533_vm3, %v581_v49, %v583_v55 }
  0xda   : > { %3716 = vmatmul.mubr.msk.bf16.gmra.mrb[92].mxu1 %vm616_vm4, %v4565_v61  ;;  %v586_v61 = vsel %vm533_vm3, %v583_v55, %v585_v18  ;;  %v4220_v18 = vld [vmem:[%s4458_s17 + $0x20] sm:$0xff]   ;;  %v1855_v55 = vrot.slane %v4224_v44, 2 }
  0xdb   : > { %3610 = vmatmul.mubr.msk.bf16.gmra.mrb[92].mxu0 %vm616_vm4, %v582_v7  ;;  %3719 = vmatprep.mubr.msk.bf16.mxu1 %vm4350_vm2, %v5822_v0  ;;  %v1847_v17 = vrot.slane %v4220_v18, 2 }
  0xdc   : > { %3613 = vmatprep.mubr.msk.bf16.mxu0 %vm4350_vm2, %v5822_v0 }
  0xdd   : > { %v1848_v23 = vsel %vm1843_vm5, %v1845_v15, %v1847_v17  ;;  %v1850_v38 = vsel %vm1843_vm5, %v1847_v17, %v1849_v30  ;;  %v4226_v30 = vld [vmem:[%s4458_s17 + $0x50] sm:$0xff]  }
  0xe2   : > { %3720 = vmatmul.mubr.msk.bf16.gmra.mrb[96].mxu1 %vm616_vm4, %v4585_v6  ;;  %v1844_v6 = vrot.slane %v4218_v12, 2 }
  0xe3   : > { %3614 = vmatmul.mubr.msk.bf16.gmra.mrb[96].mxu0 %vm616_vm4, %v584_v11  ;;  %3723 = vmatprep.mubr.msk.bf16.mxu1 %vm4350_vm2, %v5822_v0 }
  0xe4   : > { %3617 = vmatprep.mubr.msk.bf16.mxu0 %vm4350_vm2, %v5822_v0  ;;  %v1846_v13 = vsel %vm1843_vm5, %v1844_v6, %v1845_v15  ;;  %v1856_v6 = vsel %vm1843_vm5, %v1853_v27, %v1855_v55  ;;  %v4225_v15 = vld [vmem:[%s4458_s17 + $0x48] sm:$0xff]   ;;  %v1861_v27 = vrot.slane %v4227_v10, 2 }
  0xea   : > { %3724 = vmatmul.mubr.msk.bf16.gmra.mrb[100].mxu1 %vm616_vm4, %v4600_v19 }
  0xeb   : > { %3618 = vmatmul.mubr.msk.bf16.gmra.mrb[100].mxu0 %vm616_vm4, %v586_v61  ;;  %3727 = vmatprep.mubr.msk.bf16.mxu1 %vm4350_vm2, %v5822_v0 }
  0xec   : > { %3833 = vmatprep.mubr.msk.bf16.mxu0 %vm4350_vm2, %v5822_v0 }
  0xf2   : > { %3728 = vmatmul.mubr.msk.bf16.gmra.mrb[104].mxu1 %vm616_vm4, %v4612_v25 }
  0xf3   : > { %3834 = vmatmul.mubr.msk.bf16.vlgmr.msra.gmra.mrb[104].mxu0 %vm616_vm4, %v1846_v13  ;;  %3731 = vmatprep.mubr.msk.bf16.mxu1 %vm4350_vm2, %v5822_v0 }
  0xf4   : > { %3837 = vmatprep.mubr.msk.bf16.mxu0 %vm4350_vm2, %v5822_v0 }
  0xf5   : > { %v4810_v21 = vpop.f32.mrb[0].mxu1 }
  0xf6   : > { %v4808_v19 = vpop.f32.mrb[0].mxu0  ;;  %5826 = vst [vmem:[#allocation5_spill] sm:$0xff] %v4810_v21  ;;  %v3623_v26 = vpop.f32.mrb[1].mxu1 }
  0xf7   : > { %v3519_v20 = vpop.f32.mrb[1].mxu0  ;;  %v4816_v28 = vpop.f32.mrb[2].mxu1 }
  0xf8   : > { %v4812_v22 = vpop.f32.mrb[2].mxu0  ;;  %5827 = vst [vmem:[#allocation6_spill] sm:$0xff] %v4816_v28  ;;  %v3624_v29 = vpop.f32.mrb[3].mxu1  ;;  %v1857_v20 = vrot.slane %v4225_v15, 2  ;;  %v4246_v28 = vld [vmem:[%s4458_s17 + $0xe8] sm:$0xff]  }
  0xf9   : > { %v3520_v25 = vpop.f32.mrb[3].mxu0 }
  0xfa   : > { %3732 = vmatmul.mubr.msk.bf16.gmra.mrb[108].mxu1 %vm616_vm4, %v4625_v32  ;;  %v1858_v29 = vsel %vm1843_vm5, %v1855_v55, %v1857_v20 }
  0xfb   : > { %3838 = vmatmul.mubr.msk.bf16.gmra.mrb[108].mxu0 %vm616_vm4, %v1848_v23  ;;  %3735 = vmatprep.mubr.msk.bf16.mxu1 %vm4350_vm2, %v5822_v0 }
  0xfc   : > { %3841 = vmatprep.mubr.msk.bf16.mxu0 %vm4350_vm2, %v5822_v0 }
  0xfd   : > { %v4827_v35 = vpop.f32.mrb[4].mxu1 }
  0xfe   : > { %v4825_v31 = vpop.f32.mrb[4].mxu0  ;;  %5828 = vst [vmem:[#allocation7_spill] sm:$0xff] %v4827_v35  ;;  %v3627_v41 = vpop.f32.mrb[5].mxu1 }
  0xff   : > { %v3523_v34 = vpop.f32.mrb[5].mxu0  ;;  %v4833_v43 = vpop.f32.mrb[6].mxu1  ;;  %v1859_v41 = vrot.slane %v4226_v30, 2 }
 0x100   : > { %v4829_v36 = vpop.f32.mrb[6].mxu0  ;;  %5829 = vst [vmem:[#allocation8_spill] sm:$0xff] %v4833_v43  ;;  %v3628_v45 = vpop.f32.mrb[7].mxu1 }
 0x101   : > { %v3524_v32 = vpop.f32.mrb[7].mxu0 }
 0x102   : > { %3736 = vmatmul.mubr.msk.bf16.gmra.mrb[112].mxu1 %vm616_vm4, %v4637_v37 }
 0x103   : > { %3842 = vmatmul.mubr.msk.bf16.gmra.mrb[112].mxu0 %vm616_vm4, %v1850_v38  ;;  %3739 = vmatprep.mubr.msk.bf16.mxu1 %vm4350_vm2, %v5822_v0 }
 0x104   : > { %3845 = vmatprep.mubr.msk.bf16.mxu0 %vm4350_vm2, %v5822_v0 }
 0x105   : > { %v4844_v51 = vpop.f32.mrb[8].mxu1 }
 0x106   : > { %v4842_v47 = vpop.f32.mrb[8].mxu0  ;;  %5830 = vst [vmem:[#allocation9_spill] sm:$0xff] %v4844_v51  ;;  %v3631_v56 = vpop.f32.mrb[9].mxu1  ;;  %v4280_v51 = vld [vmem:[%s4458_s17 + $0x120] sm:$0xff]  }
 0x107   : > { %v3527_v50 = vpop.f32.mrb[9].mxu0  ;;  %v4850_v16 = vpop.f32.mrb[10].mxu1 }
 0x108   : > { %v4846_v8 = vpop.f32.mrb[10].mxu0  ;;  %5831 = vst [vmem:[#allocation10_spill] sm:$0xff] %v4850_v16  ;;  %v3632_v58 = vpop.f32.mrb[11].mxu1 }
 0x109   : > { %v3528_v37 = vpop.f32.mrb[11].mxu0 }
 0x10a   : > { %3740 = vmatmul.mubr.msk.bf16.gmra.mrb[116].mxu1 %vm616_vm4, %v4649_v42 }
 0x10b   : > { %3846 = vmatmul.mubr.msk.bf16.gmra.mrb[116].mxu0 %vm616_vm4, %v1852_v53  ;;  %3743 = vmatprep.mubr.msk.bf16.mxu1 %vm4350_vm2, %v5822_v0  ;;  %v1860_v53 = vsel %vm1843_vm5, %v1857_v20, %v1859_v41 }
 0x10c   : > { %3849 = vmatprep.mubr.msk.bf16.mxu0 %vm4350_vm2, %v5822_v0 }
 0x10d   : > { %v4861_v63 = vpop.f32.mrb[12].mxu1 }
 0x10e   : > { %v4859_v60 = vpop.f32.mrb[12].mxu0  ;;  %5832 = vst [vmem:[#allocation11_spill] sm:$0xff] %v4861_v63  ;;  %v3635_v4 = vpop.f32.mrb[13].mxu1  ;;  %v4279_v63 = vld [vmem:[%s4458_s17 + $0x118] sm:$0xff]  }
 0x10f   : > { %v3531_v33 = vpop.f32.mrb[13].mxu0  ;;  %v4867_v49 = vpop.f32.mrb[14].mxu1 }
 0x110   : > { %v4863_v39 = vpop.f32.mrb[14].mxu0  ;;  %5833 = vst [vmem:[#allocation12_spill] sm:$0xff] %v4867_v49  ;;  %v3636_v7 = vpop.f32.mrb[15].mxu1 }
 0x111   : > { %v3532_v42 = vpop.f32.mrb[15].mxu0  ;;  %v4228_v7 = vld [vmem:[%s4458_s17 + $0x60] sm:$0xff]  }
 0x112   : > { %3744 = vmatmul.mubr.msk.bf16.gmra.mrb[120].mxu1 %vm616_vm4, %v4662_v48  ;;  %v1862_v42 = vsel %vm1843_vm5, %v1859_v41, %v1861_v27  ;;  %v1863_v15 = vrot.slane %v4228_v7, 2 }
 0x113   : > { %3850 = vmatmul.mubr.msk.bf16.gmra.mrb[120].mxu0 %vm616_vm4, %v1854_v2  ;;  %3747 = vmatprep.mubr.msk.bf16.mxu1 %vm4350_vm2, %v5822_v0 }
 0x114   : > { %3853 = vmatprep.mubr.msk.bf16.mxu0 %vm4350_vm2, %v5822_v0 }
 0x115   : > { %v4878_v12 = vpop.f32.mrb[16].mxu1 }
 0x116   : > { %v4876_v11 = vpop.f32.mrb[16].mxu0  ;;  %5834 = vst [vmem:[#allocation13_spill] sm:$0xff] %v4878_v12  ;;  %v3639_v13 = vpop.f32.mrb[17].mxu1  ;;  %v4278_v12 = vld [vmem:[%s4458_s17 + $0x110] sm:$0xff]  }
 0x117   : > { %v3535_v61 = vpop.f32.mrb[17].mxu0  ;;  %v4884_v18 = vpop.f32.mrb[18].mxu1 }
 0x118   : > { %v4880_v14 = vpop.f32.mrb[18].mxu0  ;;  %5835 = vst [vmem:[#allocation14_spill] sm:$0xff] %v4884_v18  ;;  %v3640_v17 = vpop.f32.mrb[19].mxu1 }
 0x119   : > { %v3536_v48 = vpop.f32.mrb[19].mxu0 }
 0x11a   : > { %3748 = vmatmul.mubr.msk.bf16.gmra.mrb[124].mxu1 %vm616_vm4, %v4673_v52 }
 0x11b   : > { %3854 = vmatmul.mubr.msk.bf16.gmra.mrb[124].mxu0 %vm616_vm4, %v1856_v6  ;;  %3751 = vmatprep.mubr.msk.bf16.mxu1 %vm4350_vm2, %v5822_v0 }
 0x11c   : > { %3857 = vmatprep.mubr.msk.bf16.mxu0 %vm4350_vm2, %v5822_v0 }
 0x11d   : > { %v4895_v26 = vpop.f32.mrb[20].mxu1 }
 0x11e   : > { %v4893_v23 = vpop.f32.mrb[20].mxu0  ;;  %5836 = vst [vmem:[#allocation15_spill] sm:$0xff] %v4895_v26  ;;  %v3643_v34 = vpop.f32.mrb[21].mxu1  ;;  %v4277_v26 = vld [vmem:[%s4458_s17 + $0x108] sm:$0xff]  }
 0x11f   : > { %v3539_v24 = vpop.f32.mrb[21].mxu0  ;;  %v4901_v38 = vpop.f32.mrb[22].mxu1 }
 0x120   : > { %v4897_v25 = vpop.f32.mrb[22].mxu0  ;;  %5837 = vst [vmem:[#allocation16_spill] sm:$0xff] %v4901_v38  ;;  %v3644_v40 = vpop.f32.mrb[23].mxu1  ;;  %v1864_v24 = vsel %vm1843_vm5, %v1861_v27, %v1863_v15 }
 0x121   : > { %v3540_v52 = vpop.f32.mrb[23].mxu0 }
 0x122   : > { %3752 = vmatmul.mubr.msk.bf16.gmra.mrb[128].mxu1 %vm616_vm4, %v4685_v54 }
 0x123   : > { %3858 = vmatmul.mubr.msk.bf16.gmra.mrb[128].mxu0 %vm616_vm4, %v1858_v29  ;;  %3755 = vmatprep.mubr.msk.bf16.mxu1 %vm4350_vm2, %v5822_v0  ;;  %v4229_v29 = vld [vmem:[%s4458_s17 + $0x68] sm:$0xff]  }
 0x124   : > { %3861 = vmatprep.mubr.msk.bf16.mxu0 %vm4350_vm2, %v5822_v0  ;;  %v1865_v40 = vrot.slane %v4229_v29, 2 }
 0x125   : > { %v4912_v46 = vpop.f32.mrb[24].mxu1 }
 0x126   : > { %v4910_v32 = vpop.f32.mrb[24].mxu0  ;;  %5838 = vst [vmem:[#allocation17_spill] sm:$0xff] %v4912_v46  ;;  %v3647_v56 = vpop.f32.mrb[25].mxu1  ;;  %v4276_v46 = vld [vmem:[%s4458_s17 + $0x100] sm:$0xff]  }
 0x127   : > { %v3543_v45 = vpop.f32.mrb[25].mxu0  ;;  %v4918_v37 = vpop.f32.mrb[26].mxu1  ;;  %v1866_v56 = vsel %vm1843_vm5, %v1863_v15, %v1865_v40 }
 0x128   : > { %v4914_v50 = vpop.f32.mrb[26].mxu0  ;;  %5839 = vst [vmem:[#allocation18_spill] sm:$0xff] %v4918_v37  ;;  %v3648_v58 = vpop.f32.mrb[27].mxu1 }
 0x129   : > { %v3544_v54 = vpop.f32.mrb[27].mxu0 }
 0x12a   : > { %3756 = vmatmul.mubr.msk.bf16.gmra.mrb[132].mxu1 %vm616_vm4, %v4697_v57  ;;  %v4230_v54 = vld [vmem:[%s4458_s17 + $0x70] sm:$0xff]  }
 0x12b   : > { %3862 = vmatmul.mubr.msk.bf16.gmra.mrb[132].mxu0 %vm616_vm4, %v1860_v53  ;;  %3759 = vmatprep.mubr.msk.bf16.mxu1 %vm4350_vm2, %v5822_v0 }
 0x12c   : > { %3865 = vmatprep.mubr.msk.bf16.mxu0 %vm4350_vm2, %v5822_v0 }
 0x12d   : > { %v4929_v44 = vpop.f32.mrb[28].mxu1 }
 0x12e   : > { %v4927_v33 = vpop.f32.mrb[28].mxu0  ;;  %5840 = vst [vmem:[#allocation19_spill] sm:$0xff] %v4929_v44  ;;  %v3651_v55 = vpop.f32.mrb[29].mxu1  ;;  %v4275_v44 = vld [vmem:[%s4458_s17 + $0xf8] sm:$0xff]  }
 0x12f   : > { %v3547_v2 = vpop.f32.mrb[29].mxu0  ;;  %v4935_v61 = vpop.f32.mrb[30].mxu1 }
 0x130   : > { %v4931_v4 = vpop.f32.mrb[30].mxu0  ;;  %5841 = vst [vmem:[#allocation20_spill] sm:$0xff] %v4935_v61  ;;  %v3652_v6 = vpop.f32.mrb[31].mxu1 }
 0x131   : > { %v3548_v57 = vpop.f32.mrb[31].mxu0 }
 0x132   : > { %3760 = vmatmul.mubr.msk.bf16.gmra.mrb[136].mxu1 %vm616_vm4, %v4709_v59 }
 0x133   : > { %3866 = vmatmul.mubr.msk.bf16.gmra.mrb[136].mxu0 %vm616_vm4, %v1862_v42  ;;  %3763 = vmatprep.mubr.msk.bf16.mxu1 %vm4350_vm2, %v5822_v0  ;;  %v1867_v42 = vrot.slane %v4230_v54, 2 }
 0x134   : > { %3869 = vmatprep.mubr.msk.bf16.mxu0 %vm4350_vm2, %v5822_v0 }
 0x135   : > { %v4946_v17 = vpop.f32.mrb[32].mxu1  ;;  %v1868_v15 = vsel %vm1843_vm5, %v1865_v40, %v1867_v42 }
 0x136   : > { %v4944_v13 = vpop.f32.mrb[32].mxu0  ;;  %5842 = vst [vmem:[#allocation21_spill] sm:$0xff] %v4946_v17  ;;  %v3655_v30 = vpop.f32.mrb[33].mxu1  ;;  %v4274_v17 = vld [vmem:[%s4458_s17 + $0xf0] sm:$0xff]  }
 0x137   : > { %v3551_v48 = vpop.f32.mrb[33].mxu0  ;;  %v4952_v34 = vpop.f32.mrb[34].mxu1 }
 0x138   : > { %v4948_v20 = vpop.f32.mrb[34].mxu0  ;;  %5843 = vst [vmem:[#allocation22_spill] sm:$0xff] %v4952_v34  ;;  %v3656_v52 = vpop.f32.mrb[35].mxu1 }
 0x139   : > { %v3552_v59 = vpop.f32.mrb[35].mxu0 }
 0x13a   : > { %3764 = vmatmul.mubr.msk.bf16.gmra.mrb[140].mxu1 %vm616_vm4, %v4721_v62 }
 0x13b   : > { %3870 = vmatmul.mubr.msk.bf16.gmra.mrb[140].mxu0 %vm616_vm4, %v1864_v24  ;;  %3767 = vmatprep.mubr.msk.bf16.mxu1 %vm4350_vm2, %v5822_v0  ;;  %v4231_v24 = vld [vmem:[%s4458_s17 + $0x78] sm:$0xff]  }
 0x13c   : > { %3873 = vmatprep.mubr.msk.bf16.mxu0 %vm4350_vm2, %v5822_v0  ;;  %v1869_v59 = vrot.slane %v4231_v24, 2 }
 0x13d   : > { %v4963_v53 = vpop.f32.mrb[36].mxu1 }
 0x13e   : > { %v4961_v41 = vpop.f32.mrb[36].mxu0  ;;  %5844 = vst [vmem:[#allocation23_spill] sm:$0xff] %v4963_v53  ;;  %v3659_v58 = vpop.f32.mrb[37].mxu1  ;;  %v1870_v54 = vsel %vm1843_vm5, %v1867_v42, %v1869_v59  ;;  %v4273_v53 = vld [vmem:[%s4458_s17 + $0xe8] sm:$0xff]  }
 0x13f   : > { %v3555_v45 = vpop.f32.mrb[37].mxu0  ;;  %v4969_v27 = vpop.f32.mrb[38].mxu1 }
 0x140   : > { %v4965_v10 = vpop.f32.mrb[38].mxu0  ;;  %5845 = vst [vmem:[#allocation24_spill] sm:$0xff] %v4969_v27  ;;  %v3660_v2 = vpop.f32.mrb[39].mxu1 }
 0x141   : > { %v3556_v62 = vpop.f32.mrb[39].mxu0 }
 0x142   : > { %3768 = vmatmul.mubr.msk.bf16.gmra.mrb[144].mxu1 %vm616_vm4, %v4733_v1  ;;  %v4232_v62 = vld [vmem:[%s4458_s17 + $0x80] sm:$0xff]  }
 0x143   : > { %3874 = vmatmul.mubr.msk.bf16.gmra.mrb[144].mxu0 %vm616_vm4, %v1866_v56  ;;  %3771 = vmatprep.mubr.msk.bf16.mxu1 %vm4350_vm2, %v5822_v0 }
 0x144   : > { %3877 = vmatprep.mubr.msk.bf16.mxu0 %vm4350_vm2, %v5822_v0 }
 0x145   : > { %v4980_v57 = vpop.f32.mrb[40].mxu1 }
 0x146   : > { %v4978_v7 = vpop.f32.mrb[40].mxu0  ;;  %5846 = vst [vmem:[#allocation25_spill] sm:$0xff] %v4980_v57  ;;  %v3663_v48 = vpop.f32.mrb[41].mxu1  ;;  %v4272_v57 = vld [vmem:[%s4458_s17 + $0xe0] sm:$0xff]  }
 0x147   : > { %v3559_v55 = vpop.f32.mrb[41].mxu0  ;;  %v4986_v29 = vpop.f32.mrb[42].mxu1 }
 0x148   : > { %v4982_v6 = vpop.f32.mrb[42].mxu0  ;;  %5847 = vst [vmem:[#allocation26_spill] sm:$0xff] %v4986_v29  ;;  %v3664_v30 = vpop.f32.mrb[43].mxu1 }
 0x149   : > { %v3560_v1 = vpop.f32.mrb[43].mxu0 }
 0x14a   : > { %3772 = vmatmul.mubr.msk.bf16.gmra.mrb[148].mxu1 %vm616_vm4, %v4745_v3 }
 0x14b   : > { %3878 = vmatmul.mubr.msk.bf16.gmra.mrb[148].mxu0 %vm616_vm4, %v1868_v15  ;;  %3775 = vmatprep.mubr.msk.bf16.mxu1 %vm4350_vm2, %v5822_v0  ;;  %v1871_v15 = vrot.slane %v4232_v62, 2 }
 0x14c   : > { %3881 = vmatprep.mubr.msk.bf16.mxu0 %vm4350_vm2, %v5822_v0 }
 0x14d   : > { %v4997_v45 = vpop.f32.mrb[44].mxu1 }
 0x14e   : > { %v4995_v52 = vpop.f32.mrb[44].mxu0  ;;  %5848 = vst [vmem:[#allocation27_spill] sm:$0xff] %v4997_v45  ;;  %v3667_v58 = vpop.f32.mrb[45].mxu1 }
 0x14f   : > { %v3563_v40 = vpop.f32.mrb[45].mxu0  ;;  %v5003_v2 = vpop.f32.mrb[46].mxu1 }
 0x150   : > { %v4999_v56 = vpop.f32.mrb[46].mxu0  ;;  %5849 = vst [vmem:[#allocation28_spill] sm:$0xff] %v5003_v2  ;;  %v3668_v55 = vpop.f32.mrb[47].mxu1  ;;  %v1872_v40 = vsel %vm1843_vm5, %v1869_v59, %v1871_v15  ;;  %v4271_v2 = vld [vmem:[%s4458_s17 + $0xd8] sm:$0xff]  }
 0x151   : > { %v3564_v3 = vpop.f32.mrb[47].mxu0 }
 0x152   : > { %3776 = vmatmul.mubr.msk.bf16.gmra.mrb[152].mxu1 %vm616_vm4, %v4757_v5 }
 0x153   : > { %3882 = vmatmul.mubr.msk.bf16.gmra.mrb[152].mxu0 %vm616_vm4, %v1870_v54  ;;  %3779 = vmatprep.mubr.msk.bf16.mxu1 %vm4350_vm2, %v5822_v0  ;;  %v4233_v54 = vld [vmem:[%s4458_s17 + $0x88] sm:$0xff]  }
 0x154   : > { %3885 = vmatprep.mubr.msk.bf16.mxu0 %vm4350_vm2, %v5822_v0  ;;  %v1873_v62 = vrot.slane %v4233_v54, 2 }
 0x155   : > { %v5014_v24 = vpop.f32.mrb[48].mxu1 }
 0x156   : > { %v5012_v42 = vpop.f32.mrb[48].mxu0  ;;  %5850 = vst [vmem:[#allocation29_spill] sm:$0xff] %v5014_v24  ;;  %v3671_v30 = vpop.f32.mrb[49].mxu1 }
 0x157   : > { %v3567_v48 = vpop.f32.mrb[49].mxu0  ;;  %v5020_v58 = vpop.f32.mrb[50].mxu1 }
 0x158   : > { %v5016_v1 = vpop.f32.mrb[50].mxu0  ;;  %5851 = vst [vmem:[#allocation30_spill] sm:$0xff] %v5020_v58  ;;  %v3672_v3 = vpop.f32.mrb[51].mxu1 }
 0x159   : > { %v3568_v5 = vpop.f32.mrb[51].mxu0  ;;  %v4234_v3 = vld [vmem:[%s4458_s17 + $0x90] sm:$0xff]  }
 0x15a   : > { %3780 = vmatmul.mubr.msk.bf16.gmra.mrb[156].mxu1 %vm616_vm4, %v4769_v9  ;;  %v1874_v9 = vsel %vm1843_vm5, %v1871_v15, %v1873_v62 }
 0x15b   : > { %3886 = vmatmul.mubr.msk.bf16.gmra.mrb[156].mxu0 %vm616_vm4, %v1872_v40  ;;  %3783 = vmatprep.mubr.msk.bf16.mxu1 %vm4350_vm2, %v5822_v0 }
 0x15c   : > { %3889 = vmatprep.mubr.msk.bf16.mxu0 %vm4350_vm2, %v5822_v0 }
 0x15d   : > { %v1256_v55 = vpop.f32.mrb[52].mxu1 }
 0x15e   : > { %v5029_v59 = vpop.f32.mrb[52].mxu0  ;;  %v5032_v30 = vadd.f32 %v1256_v55, %v4808_v19  ;;  %v3677_v5 = vpop.f32.mrb[53].mxu1  ;;  %v5852_v19 = vmov 0.0   ;;  %v1875_v55 = vrot.slane %v4234_v3, 2 }
 0x15f   : > { %v3571_v48 = vpop.f32.mrb[53].mxu0  ;;  %v1259_v58 = vpop.f32.mrb[54].mxu1  ;;  %v4235_v5 = vld [vmem:[%s4458_s17 + $0x98] sm:$0xff]  }
 0x160   : > { %v5034_v40 = vpop.f32.mrb[54].mxu0  ;;  %v5039_v54 = vadd.f32 %v1259_v58, %v4812_v22  ;;  %v3678_v0 = vpop.f32.mrb[55].mxu1 }
 0x161   : > { %v3572_v24 = vpop.f32.mrb[55].mxu0 }
 0x162   : > { %3784 = vmatmul.mubr.msk.bf16.gmra.mrb[160].mxu1 %vm616_vm4, %v4271_v2  ;;  %v1876_v2 = vsel %vm1843_vm5, %v1873_v62, %v1875_v55 }
 0x163   : > { %3890 = vmatmul.mubr.msk.bf16.gmra.mrb[160].mxu0 %vm616_vm4, %v1874_v9  ;;  %3787 = vmatprep.mubr.msk.bf16.mxu1 %vm4350_vm2, %v5852_v19 }
 0x164   : > { %3893 = vmatprep.mubr.msk.bf16.mxu0 %vm4350_vm2, %v5852_v19 }
 0x165   : > { %v1264_v24 = vpop.f32.mrb[56].mxu1 }
 0x166   : > { %v5048_v15 = vpop.f32.mrb[56].mxu0  ;;  %v5051_v22 = vadd.f32 %v1264_v24, %v4825_v31  ;;  %v3681_v0 = vpop.f32.mrb[57].mxu1  ;;  %v1877_v31 = vrot.slane %v4235_v5, 2 }
 0x167   : > { %v3575_v48 = vpop.f32.mrb[57].mxu0  ;;  %v1267_v9 = vpop.f32.mrb[58].mxu1  ;;  %v4236_v0 = vld [vmem:[%s4458_s17 + $0xa0] sm:$0xff]  }
 0x168   : > { %v5053_v58 = vpop.f32.mrb[58].mxu0  ;;  %v5058_v3 = vadd.f32 %v1267_v9, %v4829_v36  ;;  %v3682_v29 = vpop.f32.mrb[59].mxu1 }
 0x169   : > { %v3576_v45 = vpop.f32.mrb[59].mxu0 }
 0x16a   : > { %3788 = vmatmul.mubr.msk.bf16.gmra.mrb[164].mxu1 %vm616_vm4, %v4272_v57  ;;  %v1878_v57 = vsel %vm1843_vm5, %v1875_v55, %v1877_v31 }
 0x16b   : > { %3894 = vmatmul.mubr.msk.bf16.gmra.mrb[164].mxu0 %vm616_vm4, %v1876_v2  ;;  %3791 = vmatprep.mubr.msk.bf16.mxu1 %vm4350_vm2, %v5852_v19 }
 0x16c   : > { %3897 = vmatprep.mubr.msk.bf16.mxu0 %vm4350_vm2, %v5852_v19 }
 0x16d   : > { %v1272_v45 = vpop.f32.mrb[60].mxu1 }
 0x16e   : > { %v5067_v62 = vpop.f32.mrb[60].mxu0  ;;  %v5070_v36 = vadd.f32 %v1272_v45, %v4842_v47  ;;  %v3685_v29 = vpop.f32.mrb[61].mxu1  ;;  %v1879_v47 = vrot.slane %v4236_v0, 2 }
 0x16f   : > { %v3579_v24 = vpop.f32.mrb[61].mxu0  ;;  %v1275_v2 = vpop.f32.mrb[62].mxu1 }
 0x170   : > { %v5072_v48 = vpop.f32.mrb[62].mxu0  ;;  %v5077_v5 = vadd.f32 %v1275_v2, %v4846_v8  ;;  %v3686_v27 = vpop.f32.mrb[63].mxu1 }
 0x171   : > { %v3580_v9 = vpop.f32.mrb[63].mxu0 }
 0x172   : > { %3792 = vmatmul.mubr.msk.bf16.gmra.mrb[168].mxu1 %vm616_vm4, %v4273_v53  ;;  %v1880_v53 = vsel %vm1843_vm5, %v1877_v31, %v1879_v47 }
 0x173   : > { %3898 = vmatmul.mubr.msk.bf16.gmra.mrb[168].mxu0 %vm616_vm4, %v1878_v57  ;;  %3795 = vmatprep.mubr.msk.bf16.mxu1 %vm4350_vm2, %v5852_v19  ;;  %v4237_v57 = vld [vmem:[%s4458_s17 + $0xa8] sm:$0xff]  }
 0x174   : > { %3901 = vmatprep.mubr.msk.bf16.mxu0 %vm4350_vm2, %v5852_v19 }
 0x175   : > { %v1280_v45 = vpop.f32.mrb[64].mxu1 }
 0x176   : > { %v5086_v55 = vpop.f32.mrb[64].mxu0  ;;  %v5089_v8 = vadd.f32 %v1280_v45, %v4859_v60  ;;  %v3689_v27 = vpop.f32.mrb[65].mxu1  ;;  %v1881_v60 = vrot.slane %v4237_v57, 2 }
 0x177   : > { %v3583_v24 = vpop.f32.mrb[65].mxu0  ;;  %v1283_v2 = vpop.f32.mrb[66].mxu1 }
 0x178   : > { %v5091_v29 = vpop.f32.mrb[66].mxu0  ;;  %v5096_v0 = vadd.f32 %v1283_v2, %v4863_v39  ;;  %v3690_v34 = vpop.f32.mrb[67].mxu1 }
 0x179   : > { %v3584_v9 = vpop.f32.mrb[67].mxu0 }
 0x17a   : > { %3796 = vmatmul.mubr.msk.bf16.gmra.mrb[172].mxu1 %vm616_vm4, %v4274_v17  ;;  %v1882_v17 = vsel %vm1843_vm5, %v1879_v47, %v1881_v60 }
 0x17b   : > { %3902 = vmatmul.mubr.msk.bf16.gmra.mrb[172].mxu0 %vm616_vm4, %v1880_v53  ;;  %3799 = vmatprep.mubr.msk.bf16.mxu1 %vm4350_vm2, %v5852_v19  ;;  %v4238_v53 = vld [vmem:[%s4458_s17 + $0xb0] sm:$0xff]  }
 0x17c   : > { %3905 = vmatprep.mubr.msk.bf16.mxu0 %vm4350_vm2, %v5852_v19 }
 0x17d   : > { %v1288_v45 = vpop.f32.mrb[68].mxu1 }
 0x17e   : > { %v5105_v31 = vpop.f32.mrb[68].mxu0  ;;  %v5108_v39 = vadd.f32 %v1288_v45, %v4876_v11  ;;  %v3693_v34 = vpop.f32.mrb[69].mxu1  ;;  %v1883_v11 = vrot.slane %v4238_v53, 2 }
 0x17f   : > { %v3587_v24 = vpop.f32.mrb[69].mxu0  ;;  %v1291_v2 = vpop.f32.mrb[70].mxu1 }
 0x180   : > { %v5110_v27 = vpop.f32.mrb[70].mxu0  ;;  %v5115_v57 = vadd.f32 %v1291_v2, %v4880_v14  ;;  %v3694_v61 = vpop.f32.mrb[71].mxu1 }
 0x181   : > { %v3588_v9 = vpop.f32.mrb[71].mxu0 }
 0x182   : > { %3800 = vmatmul.mubr.msk.bf16.gmra.mrb[176].mxu1 %vm616_vm4, %v4275_v44  ;;  %v1884_v44 = vsel %vm1843_vm5, %v1881_v60, %v1883_v11 }
 0x183   : > { %3906 = vmatmul.mubr.msk.bf16.gmra.mrb[176].mxu0 %vm616_vm4, %v1882_v17  ;;  %3803 = vmatprep.mubr.msk.bf16.mxu1 %vm4350_vm2, %v5852_v19  ;;  %v4239_v17 = vld [vmem:[%s4458_s17 + $0xb8] sm:$0xff]  }
 0x184   : > { %3909 = vmatprep.mubr.msk.bf16.mxu0 %vm4350_vm2, %v5852_v19 }
 0x185   : > { %v1296_v45 = vpop.f32.mrb[72].mxu1 }
 0x186   : > { %v5124_v47 = vpop.f32.mrb[72].mxu0  ;;  %v5127_v14 = vadd.f32 %v1296_v45, %v4893_v23  ;;  %v3697_v61 = vpop.f32.mrb[73].mxu1  ;;  %v1885_v23 = vrot.slane %v4239_v17, 2 }
 0x187   : > { %v3591_v24 = vpop.f32.mrb[73].mxu0  ;;  %v1299_v2 = vpop.f32.mrb[74].mxu1 }
 0x188   : > { %v5129_v34 = vpop.f32.mrb[74].mxu0  ;;  %v5134_v53 = vadd.f32 %v1299_v2, %v4897_v25  ;;  %v3698_v37 = vpop.f32.mrb[75].mxu1 }
 0x189   : > { %v3592_v9 = vpop.f32.mrb[75].mxu0 }
 0x18a   : > { %3804 = vmatmul.mubr.msk.bf16.gmra.mrb[180].mxu1 %vm616_vm4, %v4276_v46  ;;  %v1886_v46 = vsel %vm1843_vm5, %v1883_v11, %v1885_v23 }
 0x18b   : > { %3910 = vmatmul.mubr.msk.bf16.gmra.mrb[180].mxu0 %vm616_vm4, %v1884_v44  ;;  %3807 = vmatprep.mubr.msk.bf16.mxu1 %vm4350_vm2, %v5852_v19  ;;  %v4240_v44 = vld [vmem:[%s4458_s17 + $0xc0] sm:$0xff]  }
 0x18c   : > { %3913 = vmatprep.mubr.msk.bf16.mxu0 %vm4350_vm2, %v5852_v19 }
 0x18d   : > { %v1304_v45 = vpop.f32.mrb[76].mxu1 }
 0x18e   : > { %v5143_v60 = vpop.f32.mrb[76].mxu0  ;;  %v5146_v25 = vadd.f32 %v1304_v45, %v4910_v32  ;;  %v3701_v37 = vpop.f32.mrb[77].mxu1  ;;  %v1887_v32 = vrot.slane %v4240_v44, 2 }
 0x18f   : > { %v3595_v24 = vpop.f32.mrb[77].mxu0  ;;  %v1307_v2 = vpop.f32.mrb[78].mxu1 }
 0x190   : > { %v5148_v61 = vpop.f32.mrb[78].mxu0  ;;  %v5153_v17 = vadd.f32 %v1307_v2, %v4914_v50  ;;  %v3702_v38 = vpop.f32.mrb[79].mxu1 }
 0x191   : > { %v3596_v9 = vpop.f32.mrb[79].mxu0 }
 0x192   : > { %3808 = vmatmul.mubr.msk.bf16.gmra.mrb[184].mxu1 %vm616_vm4, %v4277_v26  ;;  %v1888_v26 = vsel %vm1843_vm5, %v1885_v23, %v1887_v32 }
 0x193   : > { %3914 = vmatmul.mubr.msk.bf16.gmra.mrb[184].mxu0 %vm616_vm4, %v1886_v46  ;;  %3811 = vmatprep.mubr.msk.bf16.mxu1 %vm4350_vm2, %v5852_v19  ;;  %v4241_v46 = vld [vmem:[%s4458_s17 + $0xc8] sm:$0xff]  }
 0x194   : > { %3917 = vmatprep.mubr.msk.bf16.mxu0 %vm4350_vm2, %v5852_v19 }
 0x195   : > { %v1312_v45 = vpop.f32.mrb[80].mxu1 }
 0x196   : > { %v5162_v11 = vpop.f32.mrb[80].mxu0  ;;  %v5165_v50 = vadd.f32 %v1312_v45, %v4927_v33  ;;  %v3705_v38 = vpop.f32.mrb[81].mxu1  ;;  %v1889_v33 = vrot.slane %v4241_v46, 2 }
 0x197   : > { %v3599_v24 = vpop.f32.mrb[81].mxu0  ;;  %v1315_v2 = vpop.f32.mrb[82].mxu1 }
 0x198   : > { %v5167_v37 = vpop.f32.mrb[82].mxu0  ;;  %v5172_v44 = vadd.f32 %v1315_v2, %v4931_v4  ;;  %v3706_v18 = vpop.f32.mrb[83].mxu1 }
 0x199   : > { %v3600_v9 = vpop.f32.mrb[83].mxu0 }
 0x19a   : > { %3812 = vmatmul.mubr.msk.bf16.gmra.mrb[188].mxu1 %vm616_vm4, %v4278_v12  ;;  %v1890_v12 = vsel %vm1843_vm5, %v1887_v32, %v1889_v33 }
 0x19b   : > { %3918 = vmatmul.mubr.msk.bf16.gmra.mrb[188].mxu0 %vm616_vm4, %v1888_v26  ;;  %3815 = vmatprep.mubr.msk.bf16.mxu1 %vm4350_vm2, %v5852_v19  ;;  %v4242_v26 = vld [vmem:[%s4458_s17 + $0xd0] sm:$0xff]  }
 0x19c   : > { %3921 = vmatprep.mubr.msk.bf16.mxu0 %vm4350_vm2, %v5852_v19 }
 0x19d   : > { %v1320_v45 = vpop.f32.mrb[84].mxu1 }
 0x19e   : > { %v5181_v23 = vpop.f32.mrb[84].mxu0  ;;  %v5184_v4 = vadd.f32 %v1320_v45, %v4944_v13  ;;  %v3709_v18 = vpop.f32.mrb[85].mxu1  ;;  %v1891_v13 = vrot.slane %v4242_v26, 2 }
 0x19f   : > { %v3603_v24 = vpop.f32.mrb[85].mxu0  ;;  %v1323_v2 = vpop.f32.mrb[86].mxu1 }
 0x1a0   : > { %v5186_v38 = vpop.f32.mrb[86].mxu0  ;;  %v5191_v46 = vadd.f32 %v1323_v2, %v4948_v20  ;;  %v3710_v49 = vpop.f32.mrb[87].mxu1 }
 0x1a1   : > { %v3604_v9 = vpop.f32.mrb[87].mxu0 }
 0x1a2   : > { %3816 = vmatmul.mubr.msk.bf16.gmra.mrb[192].mxu1 %vm616_vm4, %v4279_v63  ;;  %v1892_v63 = vsel %vm1843_vm5, %v1889_v33, %v1891_v13 }
 0x1a3   : > { %3922 = vmatmul.mubr.msk.bf16.gmra.mrb[192].mxu0 %vm616_vm4, %v1890_v12  ;;  %3819 = vmatprep.mubr.msk.bf16.mxu1 %vm4350_vm2, %v5852_v19  ;;  %v4243_v12 = vld [vmem:[%s4458_s17 + $0xd8] sm:$0xff]  }
 0x1a4   : > { %3925 = vmatprep.mubr.msk.bf16.mxu0 %vm4350_vm2, %v5852_v19 }
 0x1a5   : > { %v1328_v45 = vpop.f32.mrb[88].mxu1 }
 0x1a6   : > { %v5200_v32 = vpop.f32.mrb[88].mxu0  ;;  %v5203_v20 = vadd.f32 %v1328_v45, %v4961_v41  ;;  %v3713_v49 = vpop.f32.mrb[89].mxu1  ;;  %v1893_v41 = vrot.slane %v4243_v12, 2 }
 0x1a7   : > { %v3607_v24 = vpop.f32.mrb[89].mxu0  ;;  %v1331_v2 = vpop.f32.mrb[90].mxu1 }
 0x1a8   : > { %v5205_v18 = vpop.f32.mrb[90].mxu0  ;;  %v5210_v26 = vadd.f32 %v1331_v2, %v4965_v10  ;;  %v3714_v16 = vpop.f32.mrb[91].mxu1 }
 0x1a9   : > { %v3608_v9 = vpop.f32.mrb[91].mxu0 }
 0x1aa   : > { %3820 = vmatmul.mubr.msk.bf16.gmra.mrb[196].mxu1 %vm616_vm4, %v4280_v51  ;;  %v1894_v51 = vsel %vm1843_vm5, %v1891_v13, %v1893_v41  ;;  %v328_v13 = vld [vmem:[%s4458_s17 + $0x134] sm:$0x3] }
 0x1ab   : > { %3926 = vmatmul.mubr.msk.bf16.gmra.mrb[196].mxu0 %vm616_vm4, %v1892_v63  ;;  %3823 = vmatprep.mubr.msk.bf16.mxu1 %vm4350_vm2, %v5852_v19  ;;  %v4245_v63 = vld [vmem:[%s4458_s17 + $0xe0] sm:$0xff]  }
 0x1ac   : > { %3929 = vmatprep.mubr.msk.bf16.mxu0 %vm4350_vm2, %v5852_v19 }
 0x1ad   : > { %v1336_v45 = vpop.f32.mrb[92].mxu1 }
 0x1ae   : > { %v5219_v33 = vpop.f32.mrb[92].mxu0  ;;  %v5222_v16 = vadd.f32 %v1336_v45, %v4978_v7  ;;  %v3717_v10 = vpop.f32.mrb[93].mxu1  ;;  %v1895_v7 = vrot.slane %v4245_v63, 2 }
 0x1af   : > { %v3611_v24 = vpop.f32.mrb[93].mxu0  ;;  %v1339_v2 = vpop.f32.mrb[94].mxu1 }
 0x1b0   : > { %v5224_v49 = vpop.f32.mrb[94].mxu0  ;;  %v5229_v12 = vadd.f32 %v1339_v2, %v4982_v6  ;;  %v3718_v43 = vpop.f32.mrb[95].mxu1  ;;  %v4281_v24 = vld [vmem:[%s4458_s17 + $0x128] sm:$0xff]   ;;  %v1896_v35 = vsel %vm1843_vm5, %v1893_v41, %v1895_v7 }
 0x1b1   : > { %5853 = vst [vmem:[#allocation31_spill] sm:$0xff] %v5224_v49  ;;  %v3612_v9 = vpop.f32.mrb[95].mxu0 }
 0x1b2   : > { %3824 = vmatmul.mubr.msk.bf16.gmra.mrb[200].mxu1 %vm616_vm4, %v4281_v24  ;;  %v4282_v9 = vld [vmem:[%s4458_s17 + $0x130] sm:$0xf] }
 0x1b3   : > { %3930 = vmatmul.mubr.msk.bf16.gmra.mrb[200].mxu0 %vm616_vm4, %v1894_v51  ;;  %3827 = vmatprep.mubr.msk.bf16.mxu1 %vm4350_vm2, %v5852_v19  ;;  %v3161_v24 = vcombine.low %v4282_v9, %v328_v13 }
 0x1b4   : > { %3933 = vmatprep.mubr.msk.bf16.mxu0 %vm4350_vm2, %v5852_v19 }
 0x1b5   : > { %v1344_v10 = vpop.f32.mrb[96].mxu1 }
 0x1b6   : > { %v5239_v45 = vpop.f32.mrb[96].mxu0  ;;  %v5242_v43 = vadd.f32 %v1344_v10, %v4995_v52  ;;  %v3721_v51 = vpop.f32.mrb[97].mxu1  ;;  %v1897_v52 = vrot.slane %v4246_v28, 2 }
 0x1b7   : > { %5854 = vst [vmem:[#allocation32_spill] sm:$0xff] %v5239_v45  ;;  %v3615_v6 = vpop.f32.mrb[97].mxu0  ;;  %v1347_v63 = vpop.f32.mrb[98].mxu1 }
 0x1b8   : > { %v5244_v2 = vpop.f32.mrb[98].mxu0  ;;  %v5250_v49 = vadd.f32 %v1347_v63, %v4999_v56  ;;  %v3722_v45 = vpop.f32.mrb[99].mxu1  ;;  %v1898_v56 = vsel %vm1843_vm5, %v1895_v7, %v1897_v52 }
 0x1b9   : > { %5855 = vst [vmem:[#allocation33_spill] sm:$0xff] %v5244_v2  ;;  %v3616_v21 = vpop.f32.mrb[99].mxu0  ;;  %v4247_v45 = vld [vmem:[%s4458_s17 + $0xf0] sm:$0xff]  }
 0x1ba   : > { %3828 = vmatmul.mubr.msk.bf16.gmra.mrb[204].mxu1 %vm616_vm4, %v3161_v24 }
 0x1bb   : > { %3934 = vmatmul.mubr.msk.bf16.gmra.mrb[204].mxu0 %vm616_vm4, %v1896_v35 }
 0x1bc   : > { %3937 = vmatprep.mubr.msk.bf16.mxu0 %vm4350_vm2, %v5852_v19 }
 0x1bd   : > { %v1352_v13 = vpop.f32.mrb[100].mxu1 }
 0x1be   : > { %v5256_v10 = vpop.f32.mrb[100].mxu0  ;;  %v5259_v6 = vadd.f32 %v1352_v13, %v5012_v42  ;;  %v3725_v21 = vpop.f32.mrb[101].mxu1  ;;  %v1899_v42 = vrot.slane %v4247_v45, 2  ;;  %v5274_v13 = vld [vmem:[%s5817_s2] ss:$0 sm:$0xff] }
 0x1bf   : > { %5856 = vst [vmem:[#allocation34_spill] sm:$0xff] %v5256_v10  ;;  %v3619_v41 = vpop.f32.mrb[101].mxu0  ;;  %v1355_v35 = vpop.f32.mrb[102].mxu1 }
 0x1c0   : > { %5857 = vst [vmem:[#allocation35_spill] sm:$0xff] %v5259_v6  ;;  %v5261_v51 = vpop.f32.mrb[102].mxu0  ;;  %v5266_v24 = vadd.f32 %v1355_v35, %v5016_v1  ;;  %v3726_v28 = vpop.f32.mrb[103].mxu1 }
 0x1c1   : > { %5858 = vst [vmem:[#allocation36_spill] sm:$0xff] %v5261_v51  ;;  %v3620_v9 = vpop.f32.mrb[103].mxu0  ;;  %v4248_v28 = vld [vmem:[%s4458_s17 + $0xf8] sm:$0xff]  }
 0x1c2   : > { %5859 = vst [vmem:[#allocation37_spill] sm:$0xff] %v5266_v24 }
 0x1c3   : > { %3938 = vmatmul.mubr.msk.bf16.gmra.mrb[208].mxu0 %vm616_vm4, %v1898_v56  ;;  %v1900_v56 = vsel %vm1843_vm5, %v1897_v52, %v1899_v42 }
 0x1c4   : > { %3941 = vmatprep.mubr.msk.bf16.mxu0 %vm4350_vm2, %v5852_v19 }
 0x1c5   : > { %v1360_v7 = vpop.f32.mrb[104].mxu1 }
 0x1c6   : > { %v2080_v63 = vpop.f32.mrb[104].mxu0  ;;  %v5278_v1 = vadd.f32 %v1360_v7, %v5029_v59  ;;  %v3729_v35 = vpop.f32.mrb[105].mxu1  ;;  %v1901_v59 = vrot.slane %v4248_v28, 2 }
 0x1c7   : > { %v2391_v41 = vadd.f32 %v2080_v63, %v5032_v30  ;;  %v3835_v21 = vpop.f32.mrb[105].mxu0  ;;  %v1363_v51 = vpop.f32.mrb[106].mxu1  ;;  %v4249_v35 = vld [vmem:[%s4458_s17 + $0x100] sm:$0xff]  }
 0x1c8   : > { %v2083_v9 = vpop.f32.mrb[106].mxu0  ;;  %v5285_v6 = vadd.f32 %v1363_v51, %v5034_v40  ;;  %v3730_v2 = vpop.f32.mrb[107].mxu1  ;;  %v1902_v21 = vsel %vm1843_vm5, %v1899_v42, %v1901_v59 }
 0x1c9   : > { %v2476_v45 = vadd.f32 %v5274_v13, %v2391_v41  ;;  %v2392_v24 = vadd.f32 %v2083_v9, %v5039_v54  ;;  %v3836_v10 = vpop.f32.mrb[107].mxu0 }
 0x1cb   : > { %v2477_v30 = vadd.f32 %v5274_v13, %v2392_v24  ;;  %3942 = vmatmul.mubr.msk.bf16.gmra.mrb[212].mxu0 %vm616_vm4, %v1900_v56  ;;  %v2554_v52 = vmax.f32 %v2476_v45, 0.0 }
 0x1cc   : > { %3945 = vmatprep.mubr.msk.bf16.mxu0 %vm4350_vm2, %v5852_v19 }
 0x1cd   : > { %v2555_v63 = vmax.f32 %v2477_v30, 0.0  ;;  %v1368_v54 = vpop.f32.mrb[108].mxu1 }
 0x1ce   : > { %v2088_v7 = vpop.f32.mrb[108].mxu0  ;;  %v5295_v2 = vadd.f32 %v1368_v54, %v5048_v15  ;;  %v3733_v51 = vpop.f32.mrb[109].mxu1  ;;  %v1903_v15 = vrot.slane %v4249_v35, 2 }
 0x1cf   : > { %v5291_v41 = vpack.c.bf16 %v2555_v63, %v2554_v52  ;;  %v2393_v10 = vadd.f32 %v2088_v7, %v5051_v22  ;;  %v3839_v40 = vpop.f32.mrb[109].mxu0  ;;  %v1371_v56 = vpop.f32.mrb[110].mxu1 }
 0x1d0   : > { %v2091_v24 = vpop.f32.mrb[110].mxu0  ;;  %v5302_v30 = vadd.f32 %v1371_v56, %v5053_v58  ;;  %v3734_v52 = vpop.f32.mrb[111].mxu1  ;;  %v4250_v56 = vld [vmem:[%s4458_s17 + $0x108] sm:$0xff]  }
 0x1d1   : > { %v2478_v9 = vadd.f32 %v5274_v13, %v2393_v10  ;;  %v2394_v28 = vadd.f32 %v2091_v24, %v5058_v3  ;;  %v3840_v45 = vpop.f32.mrb[111].mxu0 }
 0x1d3   : > { %v2479_v22 = vadd.f32 %v5274_v13, %v2394_v28  ;;  %3946 = vmatmul.mubr.msk.bf16.gmra.mrb[216].mxu0 %vm616_vm4, %v1902_v21  ;;  %v2556_v42 = vmax.f32 %v2478_v9, 0.0  ;;  %v1904_v21 = vsel %vm1843_vm5, %v1901_v59, %v1903_v15 }
 0x1d4   : > { %3949 = vmatprep.mubr.msk.bf16.mxu0 %vm4350_vm2, %v5852_v19 }
 0x1d5   : > { %v2557_v63 = vmax.f32 %v2479_v22, 0.0  ;;  %v1376_v3 = vpop.f32.mrb[112].mxu1 }
 0x1d6   : > { %v2096_v7 = vpop.f32.mrb[112].mxu0  ;;  %v5312_v40 = vadd.f32 %v1376_v3, %v5067_v62  ;;  %v3737_v51 = vpop.f32.mrb[113].mxu1  ;;  %v1905_v62 = vrot.slane %v4250_v56, 2 }
 0x1d7   : > { %v5308_v54 = vpack.c.bf16 %v2557_v63, %v2556_v42  ;;  %v2395_v10 = vadd.f32 %v2096_v7, %v5070_v36  ;;  %v3843_v58 = vpop.f32.mrb[113].mxu0  ;;  %v1379_v35 = vpop.f32.mrb[114].mxu1 }
 0x1d8   : > { %v2099_v24 = vpop.f32.mrb[114].mxu0  ;;  %v5319_v52 = vadd.f32 %v1379_v35, %v5072_v48  ;;  %v3738_v22 = vpop.f32.mrb[115].mxu1 }
 0x1d9   : > { %v2480_v28 = vadd.f32 %v5274_v13, %v2395_v10  ;;  %v2396_v9 = vadd.f32 %v2099_v24, %v5077_v5  ;;  %v3844_v45 = vpop.f32.mrb[115].mxu0  ;;  %v1906_v24 = vsel %vm1843_vm5, %v1903_v15, %v1905_v62 }
 0x1db   : > { %v2481_v36 = vadd.f32 %v5274_v13, %v2396_v9  ;;  %3950 = vmatmul.mubr.msk.bf16.gmra.mrb[220].mxu0 %vm616_vm4, %v1904_v21  ;;  %v2558_v59 = vmax.f32 %v2480_v28, 0.0  ;;  %v4251_v21 = vld [vmem:[%s4458_s17 + $0x110] sm:$0xff]  }
 0x1dc   : > { %3953 = vmatprep.mubr.msk.bf16.mxu0 %vm4350_vm2, %v5852_v19 }
 0x1dd   : > { %v2559_v42 = vmax.f32 %v2481_v36, 0.0  ;;  %v1384_v5 = vpop.f32.mrb[116].mxu1 }
 0x1de   : > { %v2104_v63 = vpop.f32.mrb[116].mxu0  ;;  %v5329_v10 = vadd.f32 %v1384_v5, %v5086_v55  ;;  %v3741_v58 = vpop.f32.mrb[117].mxu1  ;;  %v1907_v55 = vrot.slane %v4251_v21, 2 }
 0x1df   : > { %v5325_v7 = vpack.c.bf16 %v2559_v42, %v2558_v59  ;;  %v2397_v3 = vadd.f32 %v2104_v63, %v5089_v8  ;;  %v3847_v48 = vpop.f32.mrb[117].mxu0  ;;  %v1387_v56 = vpop.f32.mrb[118].mxu1 }
 0x1e0   : > { %v2107_v51 = vpop.f32.mrb[118].mxu0  ;;  %v5336_v45 = vadd.f32 %v1387_v56, %v5091_v29  ;;  %v3742_v22 = vpop.f32.mrb[119].mxu1  ;;  %v1908_v58 = vsel %vm1843_vm5, %v1905_v62, %v1907_v55 }
 0x1e1   : > { %v2482_v35 = vadd.f32 %v5274_v13, %v2397_v3  ;;  %v2398_v28 = vadd.f32 %v2107_v51, %v5096_v0  ;;  %v3848_v9 = vpop.f32.mrb[119].mxu0  ;;  %v4252_v51 = vld [vmem:[%s4458_s17 + $0x118] sm:$0xff]  }
 0x1e3   : > { %v2483_v8 = vadd.f32 %v5274_v13, %v2398_v28  ;;  %3954 = vmatmul.mubr.msk.bf16.gmra.mrb[224].mxu0 %vm616_vm4, %v1906_v24  ;;  %v2560_v15 = vmax.f32 %v2482_v35, 0.0 }
 0x1e4   : > { %3957 = vmatprep.mubr.msk.bf16.mxu0 %vm4350_vm2, %v5852_v19 }
 0x1e5   : > { %v2561_v36 = vmax.f32 %v2483_v8, 0.0  ;;  %v1392_v0 = vpop.f32.mrb[120].mxu1 }
 0x1e6   : > { %v2112_v59 = vpop.f32.mrb[120].mxu0  ;;  %v5346_v5 = vadd.f32 %v1392_v0, %v5105_v31  ;;  %v3745_v3 = vpop.f32.mrb[121].mxu1  ;;  %v1909_v31 = vrot.slane %v4252_v51, 2 }
 0x1e7   : > { %v5342_v42 = vpack.c.bf16 %v2561_v36, %v2560_v15  ;;  %v2399_v63 = vadd.f32 %v2112_v59, %v5108_v39  ;;  %v3851_v29 = vpop.f32.mrb[121].mxu0  ;;  %v1395_v21 = vpop.f32.mrb[122].mxu1  ;;  %v4253_v3 = vld [vmem:[%s4458_s17 + $0x120] sm:$0xff]  }
 0x1e8   : > { %v2115_v48 = vpop.f32.mrb[122].mxu0  ;;  %v5353_v28 = vadd.f32 %v1395_v21, %v5110_v27  ;;  %v3746_v9 = vpop.f32.mrb[123].mxu1  ;;  %v1910_v29 = vsel %vm1843_vm5, %v1907_v55, %v1909_v31 }
 0x1e9   : > { %v2484_v24 = vadd.f32 %v5274_v13, %v2399_v63  ;;  %v2400_v35 = vadd.f32 %v2115_v48, %v5115_v57  ;;  %v3852_v56 = vpop.f32.mrb[123].mxu0 }
 0x1eb   : > { %v2485_v39 = vadd.f32 %v5274_v13, %v2400_v35  ;;  %3958 = vmatmul.mubr.msk.bf16.gmra.mrb[228].mxu0 %vm616_vm4, %v1908_v58  ;;  %v2562_v62 = vmax.f32 %v2484_v24, 0.0 }
 0x1ec   : > { %3961 = vmatprep.mubr.msk.bf16.mxu0 %vm4350_vm2, %v5852_v19 }
 0x1ed   : > { %v2563_v22 = vmax.f32 %v2485_v39, 0.0  ;;  %v1400_v57 = vpop.f32.mrb[124].mxu1 }
 0x1ee   : > { %v2120_v8 = vpop.f32.mrb[124].mxu0  ;;  %v5363_v59 = vadd.f32 %v1400_v57, %v5124_v47  ;;  %v3749_v0 = vpop.f32.mrb[125].mxu1  ;;  %v1911_v47 = vrot.slane %v4253_v3, 2 }
 0x1ef   : > { %v5359_v15 = vpack.c.bf16 %v2563_v22, %v2562_v62  ;;  %v2401_v36 = vadd.f32 %v2120_v8, %v5127_v14  ;;  %v3855_v27 = vpop.f32.mrb[125].mxu0  ;;  %v1403_v58 = vpop.f32.mrb[126].mxu1 }
 0x1f0   : > { %v2123_v63 = vpop.f32.mrb[126].mxu0  ;;  %v5370_v21 = vadd.f32 %v1403_v58, %v5129_v34  ;;  %v3750_v35 = vpop.f32.mrb[127].mxu1  ;;  %v4254_v27 = vld [vmem:[%s4458_s17 + $0x128] sm:$0xff]  }
 0x1f1   : > { %v2486_v48 = vadd.f32 %v5274_v13, %v2401_v36  ;;  %v2402_v51 = vadd.f32 %v2123_v63, %v5134_v53  ;;  %v3856_v24 = vpop.f32.mrb[127].mxu0  ;;  %v1912_v36 = vsel %vm1843_vm5, %v1909_v31, %v1911_v47 }
 0x1f3   : > { %v2487_v14 = vadd.f32 %v5274_v13, %v2402_v51  ;;  %3962 = vmatmul.mubr.msk.bf16.gmra.mrb[232].mxu0 %vm616_vm4, %v1910_v29  ;;  %v2564_v55 = vmax.f32 %v2486_v48, 0.0 }
 0x1f4   : > { %3965 = vmatprep.mubr.msk.bf16.mxu0 %vm4350_vm2, %v5852_v19 }
 0x1f5   : > { %v2565_v56 = vmax.f32 %v2487_v14, 0.0  ;;  %v1408_v53 = vpop.f32.mrb[128].mxu1 }
 0x1f6   : > { %v2128_v9 = vpop.f32.mrb[128].mxu0  ;;  %v5380_v22 = vadd.f32 %v1408_v53, %v5143_v60  ;;  %v3753_v8 = vpop.f32.mrb[129].mxu1  ;;  %v1913_v60 = vrot.slane %v4254_v27, 2 }
 0x1f7   : > { %v5376_v39 = vpack.c.bf16 %v2565_v56, %v2564_v55  ;;  %v2403_v62 = vadd.f32 %v2128_v9, %v5146_v25  ;;  %v3859_v34 = vpop.f32.mrb[129].mxu0  ;;  %v1411_v63 = vpop.f32.mrb[130].mxu1 }
 0x1f8   : > { %v2131_v57 = vpop.f32.mrb[130].mxu0  ;;  %v5387_v48 = vadd.f32 %v1411_v63, %v5148_v61  ;;  %v3754_v58 = vpop.f32.mrb[131].mxu1  ;;  %v1914_v53 = vsel %vm1843_vm5, %v1911_v47, %v1913_v60 }
 0x1f9   : > { %v2488_v0 = vadd.f32 %v5274_v13, %v2403_v62  ;;  %v2404_v29 = vadd.f32 %v2131_v57, %v5153_v17  ;;  %v3860_v3 = vpop.f32.mrb[131].mxu0  ;;  %v4255_v62 = vld [vmem:[%s4458_s17 + $0x130] sm:$0xff]  }
 0x1fb   : > { %v2489_v25 = vadd.f32 %v5274_v13, %v2404_v29  ;;  %3966 = vmatmul.mubr.msk.bf16.gmra.mrb[236].mxu0 %vm616_vm4, %v1912_v36  ;;  %v2566_v31 = vmax.f32 %v2488_v0, 0.0 }
 0x1fc   : > { %3969 = vmatprep.mubr.msk.bf16.mxu0 %vm4350_vm2, %v5852_v19 }
 0x1fd   : > { %v2567_v51 = vmax.f32 %v2489_v25, 0.0  ;;  %v1416_v17 = vpop.f32.mrb[132].mxu1 }
 0x1fe   : > { %v2136_v24 = vpop.f32.mrb[132].mxu0  ;;  %v5397_v55 = vadd.f32 %v1416_v17, %v5162_v11  ;;  %v3757_v56 = vpop.f32.mrb[133].mxu1  ;;  %v1915_v11 = vrot.slane %v4255_v62, 2  ;;  %v4256_v17 = vld [vmem:[%s4458_s17 + $0x138] sm:$0xff]  }
 0x1ff   : > { %v5393_v35 = vpack.c.bf16 %v2567_v51, %v2566_v31  ;;  %v2405_v14 = vadd.f32 %v2136_v24, %v5165_v50  ;;  %v3863_v61 = vpop.f32.mrb[133].mxu0  ;;  %v1419_v8 = vpop.f32.mrb[134].mxu1 }
 0x200   : > { %v2139_v9 = vpop.f32.mrb[134].mxu0  ;;  %v5404_v27 = vadd.f32 %v1419_v8, %v5167_v37  ;;  %v3758_v0 = vpop.f32.mrb[135].mxu1  ;;  %v1916_v24 = vsel %vm1843_vm5, %v1913_v60, %v1915_v11 }
 0x201   : > { %v2490_v34 = vadd.f32 %v5274_v13, %v2405_v14  ;;  %v2406_v57 = vadd.f32 %v2139_v9, %v5172_v44  ;;  %v3864_v36 = vpop.f32.mrb[135].mxu0 }
 0x202   : > { %v1917_v36 = vrot.slane %v4256_v17, 2 }
 0x203   : > { %v2491_v50 = vadd.f32 %v5274_v13, %v2406_v57  ;;  %3970 = vmatmul.mubr.msk.bf16.gmra.mrb[240].mxu0 %vm616_vm4, %v1914_v53  ;;  %v2568_v47 = vmax.f32 %v2490_v34, 0.0  ;;  %v4351_v53 = vmov 1983009808   ;;  %v2640_v34 = vlaneseq }
 0x204   : > { %3973 = vmatprep.mubr.msk.bf16.mxu0 %vm4350_vm2, %v5852_v19  ;;  %v2638_v62 = vunpack.c.l.s4 %v4351_v53  ;;  %v1918_v17 = vsel %vm1843_vm5, %v1915_v11, %v1917_v36 }
 0x205   : > { %v2569_v63 = vmax.f32 %v2491_v50, 0.0  ;;  %v1424_v44 = vpop.f32.mrb[136].mxu1  ;;  %v2641_v60 = vshrl.u32 %v2640_v34, 7 }
 0x206   : > { %v2144_v29 = vpop.f32.mrb[136].mxu0  ;;  %v5414_v25 = vadd.f32 %v1424_v44, %v5181_v23  ;;  %v3761_v31 = vpop.f32.mrb[137].mxu1  ;;  %v2639_v57 = vunpack.c.0.s8 %v2638_v62 }
 0x207   : > { %v5410_v3 = vpack.c.bf16 %v2569_v63, %v2568_v47  ;;  %v2407_v58 = vadd.f32 %v2144_v29, %v5184_v4  ;;  %v3867_v37 = vpop.f32.mrb[137].mxu0  ;;  %v1427_v61 = vpop.f32.mrb[138].mxu1 }
 0x208   : > { %v2147_v51 = vpop.f32.mrb[138].mxu0  ;;  %v5421_v4 = vadd.f32 %v1427_v61, %v5186_v38  ;;  %v3762_v8 = vpop.f32.mrb[139].mxu1  ;;  %v5427_v50 = vsub.s32 %v2639_v57, %v2641_v60  ;;  %v5432_v38 = vld [vmem:[%s5818_s3] sm:$0xff] }
 0x209   : > { %v2492_v14 = vadd.f32 %v5274_v13, %v2407_v58  ;;  %v2408_v56 = vadd.f32 %v2147_v51, %v5191_v46  ;;  %v3868_v9 = vpop.f32.mrb[139].mxu0 }
 0x20a   : > { %v5437_v37 = vrot.slane %v5432_v38, %v5427_v50 }
 0x20b   : > { %v2493_v23 = vadd.f32 %v5274_v13, %v2408_v56  ;;  %3974 = vmatmul.mubr.msk.bf16.gmra.mrb[244].mxu0 %vm616_vm4, %v1916_v24  ;;  %v2570_v46 = vmax.f32 %v2492_v14, 0.0  ;;  %v4257_v14 = vld [vmem:[%s4458_s17 + $0x140] sm:$0xff]   ;;  %s3076_s17 = sshll.u32 %s242_s16, 1 }
 0x20c   : > { %3977 = vmatprep.mubr.msk.bf16.mxu0 %vm4350_vm2, %v5852_v19  ;;  %v2651_v53 = vcombine.high %v5437_v37, %v5437_v37  ;;  %s244_s19 = scalar_lea.vmem [#allocation2], %s3076_s17 }
 0x20d   : > { %v2571_v0 = vmax.f32 %v2493_v23, 0.0  ;;  %v1432_v63 = vpop.f32.mrb[140].mxu1  ;;  %s3013_s20 = sshll.u32 %s244_s19, 4  ;;  %s5775_s20 = int_to_ptr.vmem [resolvable:$true] %s3013_s20 }
 0x20e   : > { %v2152_v47 = vpop.f32.mrb[140].mxu0  ;;  %v5440_v31 = vadd.f32 %v1432_v63, %v5200_v32  ;;  %v3765_v51 = vpop.f32.mrb[141].mxu1  ;;  %2734 = vmatprep.mubr.f32.mxu1 %v2651_v53  ;;  %v5861_v53 = vld [vmem:[#allocation32_spill] sm:$0xff]  ;;  %s4284_s10 = scalar_lea.vmem %s5775_s20, 32  ;;  %p4291_p0 = scmp.lt.s32.totalorder %s5775_s20, %s4289_s11 }
 0x20f   : > { %v2409_v29 = vadd.f32 %v2152_v47, %v5203_v20  ;;  %v3871_v44 = vpop.f32.mrb[141].mxu0  ;;  %v4040_v58 = vpack.c.bf16 %v2571_v0, %v2570_v46  ;;  %v1435_v56 = vpop.f32.mrb[142].mxu1  ;;  %p4285_p11 = scmp.ne.s32.totalorder %s5775_s20, %s4284_s10  ;;  %p4292_p1 = scmp.lt.s32.totalorder %s4290_s12, %s4284_s10 }
 0x210   : > { %v2155_v24 = vpop.f32.mrb[142].mxu0  ;;  %v5449_v62 = vadd.f32 %v1435_v56, %v5205_v18  ;;  %v3766_v32 = vpop.f32.mrb[143].mxu1 }
 0x211   : > { %v2494_v61 = vadd.f32 %v5274_v13, %v2409_v29  ;;  %v2410_v9 = vadd.f32 %v2155_v24, %v5210_v26  ;;  %4041 = vmatprep.subr.bf16.mxu1 %v4040_v58  ;;  %v3872_v20 = vpop.f32.mrb[143].mxu0  ;;  %v1919_v26 = vrot.slane %v4257_v14, 2  ;;  %v5860_v24 = vld [vmem:[#allocation31_spill] sm:$0xff]  ;;  %p4286_p12 = pnand %p4285_p11, %p4428_p5  ;;  %p4293_p2 = por %p4292_p1, %p4291_p0 }
 0x212   : > { %4043 = vmatpush3.bf16.msra.mxu1 %v5291_v41 }
 0x213   : > { %v2495_v34 = vadd.f32 %v5274_v13, %v2410_v9  ;;  %3978 = vmatmul.mubr.msk.bf16.gmra.mrb[248].mxu0 %vm616_vm4, %v1918_v17  ;;  %v2572_v11 = vmax.f32 %v2494_v61, 0.0  ;;  %v1920_v63 = vsel %vm1843_vm5, %v1917_v36, %v1919_v26  ;;  %p4287_p13 = pneg %p4286_p12 }
 0x214   : > { %3981 = vmatprep.mubr.msk.bf16.mxu0 %vm4350_vm2, %v5852_v19 }
 0x215   : > { %v2573_v8 = vmax.f32 %v2495_v34, 0.0  ;;  %v1440_v57 = vpop.f32.mrb[144].mxu1  ;;  %p4294_p3 = pnand %p4293_p2, %p4287_p13 }
 0x216   : > { %v2160_v23 = vpop.f32.mrb[144].mxu0  ;;  %v5458_v41 = vadd.f32 %v1440_v57, %v5219_v33  ;;  %v3769_v0 = vpop.f32.mrb[145].mxu1 }
 0x217   : > { %v2411_v60 = vadd.f32 %v2160_v23, %v5222_v16  ;;  %v3875_v18 = vpop.f32.mrb[145].mxu0  ;;  %v4044_v46 = vpack.c.bf16 %v2573_v8, %v2572_v11  ;;  %v1443_v44 = vpop.f32.mrb[146].mxu1 }
 0x218   : > { %v2163_v47 = vpop.f32.mrb[146].mxu0  ;;  %v5464_v17 = vadd.f32 %v1443_v44, %v5860_v24  ;;  %v3770_v16 = vpop.f32.mrb[147].mxu1  ;;  %v5863_v44 = vld [vmem:[#allocation35_spill] sm:$0xff]  ;;  %v5864_v24 = vld [vmem:[#allocation34_spill] sm:$0xff] }
 0x219   : > { %v2496_v29 = vadd.f32 %v5274_v13, %v2411_v60  ;;  %v2412_v58 = vadd.f32 %v2163_v47, %v5229_v12  ;;  %4045 = vmatprep.subr.bf16.mxu1 %v4044_v46  ;;  %v3876_v51 = vpop.f32.mrb[147].mxu0  ;;  %v5862_v60 = vld [vmem:[#allocation33_spill] sm:$0xff] }
 0x21a   : > { %4047 = vmatpush3.bf16.msra.mxu1 %v5308_v54 }
 0x21b   : > { %v2497_v33 = vadd.f32 %v5274_v13, %v2412_v58  ;;  %3982 = vmatmul.mubr.msk.bf16.gmra.mrb[252].mxu0 %vm616_vm4, %v1920_v63  ;;  %v2574_v36 = vmax.f32 %v2496_v29, 0.0 }
 0x21c   : > { %3985 = vmatprep.mubr.msk.bf16.mxu0 %vm4350_vm2, %v5852_v19 }
 0x21d   : > { %v2575_v14 = vmax.f32 %v2497_v33, 0.0  ;;  %v1448_v56 = vpop.f32.mrb[148].mxu1 }
 0x21e   : > { %v2168_v61 = vpop.f32.mrb[148].mxu0  ;;  %v5473_v32 = vadd.f32 %v1448_v56, %v5861_v53  ;;  %v3773_v54 = vpop.f32.mrb[149].mxu1 }
 0x21f   : > { %v2413_v12 = vadd.f32 %v2168_v61, %v5242_v43  ;;  %v3879_v9 = vpop.f32.mrb[149].mxu0  ;;  %v4048_v20 = vpack.c.bf16 %v2575_v14, %v2574_v36  ;;  %v1451_v8 = vpop.f32.mrb[150].mxu1  ;;  %v5865_v61 = vld [vmem:[#allocation37_spill] sm:$0xff] }
 0x220   : > { %v2171_v34 = vpop.f32.mrb[150].mxu0  ;;  %v5478_v18 = vadd.f32 %v1451_v8, %v5862_v60  ;;  %v3774_v43 = vpop.f32.mrb[151].mxu1 }
 0x221   : > { %v2498_v11 = vadd.f32 %v5274_v13, %v2413_v12  ;;  %v2414_v23 = vadd.f32 %v2171_v34, %v5250_v49  ;;  %4049 = vmatprep.subr.bf16.mxu1 %v4048_v20  ;;  %v3880_v57 = vpop.f32.mrb[151].mxu0  ;;  %v5866_v12 = vld [vmem:[#allocation36_spill] sm:$0xff]  ;;  %v5867_v43 = vld [vmem:[#allocation5_spill] sm:$0xff] }
 0x222   : > { %4051 = vmatpush3.bf16.msra.mxu1 %v5325_v7 }
 0x223   : > { %v2499_v46 = vadd.f32 %v5274_v13, %v2414_v23  ;;  %3986 = vmatmul.mubr.msk.bf16.gmra.mrb[0].mxu0 %vm616_vm4, %v1919_v26  ;;  %v2576_v0 = vmax.f32 %v2498_v11, 0.0 }
 0x225   : > { %v2577_v47 = vmax.f32 %v2499_v46, 0.0  ;;  %v1456_v29 = vpop.f32.mrb[152].mxu1 }
 0x226   : > { %v2176_v63 = vpop.f32.mrb[152].mxu0  ;;  %v5485_v16 = vadd.f32 %v1456_v29, %v5864_v24  ;;  %v3777_v33 = vpop.f32.mrb[153].mxu1 }
 0x227   : > { %v2415_v58 = vadd.f32 %v2176_v63, %v5863_v44  ;;  %v3883_v51 = vpop.f32.mrb[153].mxu0  ;;  %v4052_v49 = vpack.c.bf16 %v2577_v47, %v2576_v0  ;;  %v1459_v14 = vpop.f32.mrb[154].mxu1 }
 0x228   : > { %v2179_v36 = vpop.f32.mrb[154].mxu0  ;;  %v5490_v9 = vadd.f32 %v1459_v14, %v5866_v12  ;;  %v3778_v20 = vpop.f32.mrb[155].mxu1 }
 0x229   : > { %v2500_v7 = vadd.f32 %v5274_v13, %v2415_v58  ;;  %v2416_v56 = vadd.f32 %v2179_v36, %v5865_v61  ;;  %4053 = vmatprep.subr.bf16.mxu1 %v4052_v49  ;;  %v3884_v26 = vpop.f32.mrb[155].mxu0  ;;  %v5868_v58 = vld [vmem:[#allocation6_spill] sm:$0xff] }
 0x22a   : > { %4055 = vmatpush3.bf16.msra.mxu1 %v5342_v42  ;;  %v5869_v26 = vld [vmem:[#allocation7_spill] sm:$0xff] }
 0x22b   : > { %v2501_v53 = vadd.f32 %v5274_v13, %v2416_v56  ;;  %v2578_v54 = vmax.f32 %v2500_v7, 0.0 }
 0x22d   : > { %v2579_v34 = vmax.f32 %v2501_v53, 0.0  ;;  %v1464_v8 = vpop.f32.mrb[156].mxu1 }
 0x22e   : > { %v2184_v11 = vpop.f32.mrb[156].mxu0  ;;  %v5496_v46 = vadd.f32 %v1464_v8, %v5867_v43  ;;  %v3781_v0 = vpop.f32.mrb[157].mxu1 }
 0x22f   : > { %v2417_v23 = vadd.f32 %v2184_v11, %v5278_v1  ;;  %v3887_v57 = vpop.f32.mrb[157].mxu0  ;;  %v4056_v60 = vpack.c.bf16 %v2579_v34, %v2578_v54  ;;  %v1467_v29 = vpop.f32.mrb[158].mxu1  ;;  %v5870_v11 = vld [vmem:[#allocation8_spill] sm:$0xff] }
 0x230   : > { %v2187_v47 = vpop.f32.mrb[158].mxu0  ;;  %v5501_v51 = vadd.f32 %v1467_v29, %v5868_v58  ;;  %v3782_v1 = vpop.f32.mrb[159].mxu1 }
 0x231   : > { %v2502_v63 = vadd.f32 %v5274_v13, %v2417_v23  ;;  %v2418_v42 = vadd.f32 %v2187_v47, %v5285_v6  ;;  %4057 = vmatprep.subr.bf16.mxu1 %v4056_v60  ;;  %v3888_v44 = vpop.f32.mrb[159].mxu0 }
 0x232   : > { %4059 = vmatpush3.bf16.msra.mxu1 %v5359_v15 }
 0x233   : > { %v2503_v49 = vadd.f32 %v5274_v13, %v2418_v42  ;;  %v2580_v24 = vmax.f32 %v2502_v63, 0.0  ;;  %v5871_v42 = vld [vmem:[#allocation9_spill] sm:$0xff] }
 0x235   : > { %v2581_v33 = vmax.f32 %v2503_v49, 0.0  ;;  %v1472_v7 = vpop.f32.mrb[160].mxu1 }
 0x236   : > { %v2192_v36 = vpop.f32.mrb[160].mxu0  ;;  %v5507_v6 = vadd.f32 %v1472_v7, %v5869_v26  ;;  %v3785_v12 = vpop.f32.mrb[161].mxu1 }
 0x237   : > { %v2419_v14 = vadd.f32 %v2192_v36, %v5295_v2  ;;  %v3891_v61 = vpop.f32.mrb[161].mxu0  ;;  %v4060_v56 = vpack.c.bf16 %v2581_v33, %v2580_v24  ;;  %v1475_v54 = vpop.f32.mrb[162].mxu1  ;;  %v5872_v33 = vld [vmem:[#allocation10_spill] sm:$0xff] }
 0x238   : > { %v2195_v20 = vpop.f32.mrb[162].mxu0  ;;  %v5512_v8 = vadd.f32 %v1475_v54, %v5870_v11  ;;  %v3786_v2 = vpop.f32.mrb[163].mxu1  ;;  %v5873_v54 = vld [vmem:[#allocation11_spill] sm:$0xff]  ;;  %v2636_v11 = vcombine.high %v5432_v38, %v5432_v38 }
 0x239   : > { %v2504_v53 = vadd.f32 %v5274_v13, %v2419_v14  ;;  %v2420_v15 = vadd.f32 %v2195_v20, %v5302_v30  ;;  %4061 = vmatprep.subr.bf16.mxu1 %v4060_v56  ;;  %v3892_v34 = vpop.f32.mrb[163].mxu0 }
 0x23a   : > { %4063 = vmatpush3.bf16.msra.mxu1 %v5376_v39 }
 0x23b   : > { %v2505_v23 = vadd.f32 %v5274_v13, %v2420_v15  ;;  %v2582_v57 = vmax.f32 %v2504_v53, 0.0 }
 0x23d   : > { %v2583_v60 = vmax.f32 %v2505_v23, 0.0  ;;  %v1480_v0 = vpop.f32.mrb[164].mxu1 }
 0x23e   : > { %v2200_v43 = vpop.f32.mrb[164].mxu0  ;;  %v5518_v30 = vadd.f32 %v1480_v0, %v5871_v42  ;;  %v3789_v44 = vpop.f32.mrb[165].mxu1  ;;  %v5540_v0 = vrot.slane %v2636_v11, %v5427_v50 }
 0x23f   : > { %v2421_v47 = vadd.f32 %v2200_v43, %v5312_v40  ;;  %v3895_v63 = vpop.f32.mrb[165].mxu0  ;;  %v4064_v29 = vpack.c.bf16 %v2583_v60, %v2582_v57  ;;  %v1483_v49 = vpop.f32.mrb[166].mxu1  ;;  %v5874_v60 = vld [vmem:[#allocation12_spill] sm:$0xff] }
 0x240   : > { %v2203_v58 = vpop.f32.mrb[166].mxu0  ;;  %v5523_v36 = vadd.f32 %v1483_v49, %v5872_v33  ;;  %v3790_v40 = vpop.f32.mrb[167].mxu1  ;;  %v2652_v38 = vcombine.high %v5540_v0, %v5540_v0 }
 0x241   : > { %v2506_v1 = vadd.f32 %v5274_v13, %v2421_v47  ;;  %v2422_v39 = vadd.f32 %v2203_v58, %v5319_v52  ;;  %4065 = vmatprep.subr.bf16.mxu1 %v4064_v29  ;;  %v3896_v24 = vpop.f32.mrb[167].mxu0 }
 0x242   : > { %4067 = vmatpush3.bf16.msra.mxu1 %v5393_v35 }
 0x243   : > { %v2507_v7 = vadd.f32 %v5274_v13, %v2422_v39  ;;  %v2584_v14 = vmax.f32 %v2506_v1, 0.0  ;;  %v5875_v1 = vld [vmem:[#allocation13_spill] sm:$0xff] }
 0x245   : > { %v2585_v61 = vmax.f32 %v2507_v7, 0.0  ;;  %v1488_v26 = vpop.f32.mrb[168].mxu1 }
 0x246   : > { %v2208_v56 = vpop.f32.mrb[168].mxu0  ;;  %v5529_v52 = vadd.f32 %v1488_v26, %v5873_v54  ;;  %v3793_v15 = vpop.f32.mrb[169].mxu1 }
 0x247   : > { %v2423_v12 = vadd.f32 %v2208_v56, %v5329_v10  ;;  %v3899_v20 = vpop.f32.mrb[169].mxu0  ;;  %v4068_v53 = vpack.c.bf16 %v2585_v61, %v2584_v14  ;;  %v1491_v2 = vpop.f32.mrb[170].mxu1 }
 0x248   : > { %v2211_v34 = vpop.f32.mrb[170].mxu0  ;;  %v5536_v43 = vadd.f32 %v1491_v2, %v5874_v60  ;;  %v3794_v10 = vpop.f32.mrb[171].mxu1 }
 0x249   : > { %v2508_v35 = vadd.f32 %v5274_v13, %v2423_v12  ;;  %v2424_v23 = vadd.f32 %v2211_v34, %v5336_v45  ;;  %4069 = vmatprep.subr.bf16.mxu1 %v4068_v53  ;;  %v3900_v57 = vpop.f32.mrb[171].mxu0  ;;  %v5877_v34 = vld [vmem:[#allocation15_spill] sm:$0xff]  ;;  %v5878_v10 = vld [vmem:[#allocation16_spill] sm:$0xff] }
 0x24a   : > { %4071 = vmatpush3.bf16.msra.mxu1 %v5410_v3 }
 0x24b   : > { %v2509_v47 = vadd.f32 %v5274_v13, %v2424_v23  ;;  %v2586_v63 = vmax.f32 %v2508_v35, 0.0 }
 0x24d   : > { %v2587_v29 = vmax.f32 %v2509_v47, 0.0  ;;  %2735 = vmatmul.mubr.f32.vlgmr.msra.gmra.mrb[208].mxu1 %v5437_v37  ;;  %v1496_v44 = vpop.f32.mrb[172].mxu1  ;;  %v5876_v37 = vld [vmem:[#allocation14_spill] sm:$0xff] }
 0x24e   : > { %v2216_v45 = vpop.f32.mrb[172].mxu0  ;;  %2804 = vmatprep.mubr.f32.mxu1 %v2652_v38  ;;  %v5550_v50 = vadd.f32 %v1496_v44, %v5875_v1  ;;  %v3797_v49 = vpop.f32.mrb[173].mxu1 }
 0x24f   : > { %v5546_v42 = vpack.c.bf16 %v2587_v29, %v2586_v63  ;;  %v2425_v3 = vadd.f32 %v2216_v45, %v5346_v5  ;;  %v3903_v58 = vpop.f32.mrb[173].mxu0  ;;  %v1499_v33 = vpop.f32.mrb[174].mxu1  ;;  %v5879_v49 = vld [vmem:[#allocation17_spill] sm:$0xff] }
 0x250   : > { %v2219_v39 = vpop.f32.mrb[174].mxu0  ;;  %v5555_v14 = vadd.f32 %v1499_v33, %v5876_v37  ;;  %v3798_v61 = vpop.f32.mrb[175].mxu1 }
 0x251   : > { %v2510_v24 = vadd.f32 %v5274_v13, %v2425_v3  ;;  %v2426_v40 = vadd.f32 %v2219_v39, %v5353_v28  ;;  %v3904_v7 = vpop.f32.mrb[175].mxu0  ;;  %v5880_v61 = vld [vmem:[#allocation18_spill] sm:$0xff] }
 0x253   : > { %v2511_v56 = vadd.f32 %v5274_v13, %v2426_v40  ;;  %v2588_v26 = vmax.f32 %v2510_v24, 0.0 }
 0x255   : > { %v2589_v5 = vmax.f32 %v2511_v56, 0.0  ;;  %v1504_v53 = vpop.f32.mrb[176].mxu1 }
 0x256   : > { %v2224_v12 = vpop.f32.mrb[176].mxu0  ;;  %v5562_v11 = vadd.f32 %v1504_v53, %v5877_v34  ;;  %v3801_v28 = vpop.f32.mrb[177].mxu1 }
 0x257   : > { %v5558_v20 = vpack.c.bf16 %v2589_v5, %v2588_v26  ;;  %v2427_v54 = vadd.f32 %v2224_v12, %v5363_v59  ;;  %v3907_v15 = vpop.f32.mrb[177].mxu0  ;;  %v1507_v23 = vpop.f32.mrb[178].mxu1 }
 0x258   : > { %v2227_v35 = vpop.f32.mrb[178].mxu0  ;;  %v5567_v47 = vadd.f32 %v1507_v23, %v5878_v10  ;;  %v3802_v38 = vpop.f32.mrb[179].mxu1 }
 0x259   : > { %v2512_v2 = vadd.f32 %v5274_v13, %v2427_v54  ;;  %v2428_v57 = vadd.f32 %v2227_v35, %v5370_v21  ;;  %v3908_v60 = vpop.f32.mrb[179].mxu0  ;;  %v5881_v35 = vld [vmem:[#allocation19_spill] sm:$0xff] }
 0x25b   : > { %v2513_v63 = vadd.f32 %v5274_v13, %v2428_v57  ;;  %v2590_v29 = vmax.f32 %v2512_v2, 0.0 }
 0x25d   : > { %v2591_v59 = vmax.f32 %v2513_v63, 0.0  ;;  %v1512_v3 = vpop.f32.mrb[180].mxu1  ;;  %v5882_v63 = vld [vmem:[#allocation20_spill] sm:$0xff] }
 0x25e   : > { %v2232_v45 = vpop.f32.mrb[180].mxu0  ;;  %v5574_v39 = vadd.f32 %v1512_v3, %v5879_v49  ;;  %v3805_v21 = vpop.f32.mrb[181].mxu1 }
 0x25f   : > { %v5570_v44 = vpack.c.bf16 %v2591_v59, %v2590_v29  ;;  %v2429_v58 = vadd.f32 %v2232_v45, %v5380_v22  ;;  %v3911_v1 = vpop.f32.mrb[181].mxu0  ;;  %v1515_v40 = vpop.f32.mrb[182].mxu1 }
 0x260   : > { %v2235_v24 = vpop.f32.mrb[182].mxu0  ;;  %v5579_v56 = vadd.f32 %v1515_v40, %v5880_v61  ;;  %v3806_v26 = vpop.f32.mrb[183].mxu1 }
 0x261   : > { %v2514_v33 = vadd.f32 %v5274_v13, %v2429_v58  ;;  %v2430_v7 = vadd.f32 %v2235_v24, %v5387_v48  ;;  %v3912_v37 = vpop.f32.mrb[183].mxu0 }
 0x263   : > { %v2515_v5 = vadd.f32 %v5274_v13, %v2430_v7  ;;  %v2592_v12 = vmax.f32 %v2514_v33, 0.0  ;;  %v5883_v33 = vld [vmem:[#allocation21_spill] sm:$0xff] }
 0x265   : > { %v2593_v22 = vmax.f32 %v2515_v5, 0.0  ;;  %v1520_v15 = vpop.f32.mrb[184].mxu1 }
 0x266   : > { %v2240_v53 = vpop.f32.mrb[184].mxu0  ;;  %v5586_v2 = vadd.f32 %v1520_v15, %v5881_v35  ;;  %v3809_v48 = vpop.f32.mrb[185].mxu1 }
 0x267   : > { %v5582_v54 = vpack.c.bf16 %v2593_v22, %v2592_v12  ;;  %v2431_v34 = vadd.f32 %v2240_v53, %v5397_v55  ;;  %v3915_v28 = vpop.f32.mrb[185].mxu0  ;;  %v1523_v60 = vpop.f32.mrb[186].mxu1  ;;  %v5884_v12 = vld [vmem:[#allocation22_spill] sm:$0xff] }
 0x268   : > { %v2243_v23 = vpop.f32.mrb[186].mxu0  ;;  %v5591_v29 = vadd.f32 %v1523_v60, %v5882_v63  ;;  %v3810_v59 = vpop.f32.mrb[187].mxu1  ;;  %v5885_v60 = vld [vmem:[#allocation23_spill] sm:$0xff] }
 0x269   : > { %v2516_v57 = vadd.f32 %v5274_v13, %v2431_v34  ;;  %v2432_v10 = vadd.f32 %v2243_v23, %v5404_v27  ;;  %v3916_v38 = vpop.f32.mrb[187].mxu0 }
 0x26b   : > { %v2517_v45 = vadd.f32 %v5274_v13, %v2432_v10  ;;  %v2594_v3 = vmax.f32 %v2516_v57, 0.0 }
 0x26d   : > { %v2595_v55 = vmax.f32 %v2517_v45, 0.0  ;;  %v1528_v49 = vpop.f32.mrb[188].mxu1 }
 0x26e   : > { %v2248_v58 = vpop.f32.mrb[188].mxu0  ;;  %v5598_v40 = vadd.f32 %v1528_v49, %v5883_v33  ;;  %v3813_v27 = vpop.f32.mrb[189].mxu1 }
 0x26f   : > { %v5594_v1 = vpack.c.bf16 %v2595_v55, %v2594_v3  ;;  %v2433_v21 = vadd.f32 %v2248_v58, %v5414_v25  ;;  %v3919_v24 = vpop.f32.mrb[189].mxu0  ;;  %v1531_v61 = vpop.f32.mrb[190].mxu1  ;;  %v5886_v55 = vld [vmem:[#allocation24_spill] sm:$0xff] }
 0x270   : > { %v2251_v7 = vpop.f32.mrb[190].mxu0  ;;  %v5603_v22 = vadd.f32 %v1531_v61, %v5884_v12  ;;  %v3814_v53 = vpop.f32.mrb[191].mxu1 }
 0x271   : > { %v2518_v37 = vadd.f32 %v5274_v13, %v2433_v21  ;;  %v2434_v26 = vadd.f32 %v2251_v7, %v5421_v4  ;;  %v3920_v5 = vpop.f32.mrb[191].mxu0 }
 0x273   : > { %v2519_v15 = vadd.f32 %v5274_v13, %v2434_v26  ;;  %v2596_v34 = vmax.f32 %v2518_v37, 0.0  ;;  %v5887_v26 = vld [vmem:[#allocation25_spill] sm:$0xff] }
 0x275   : > { %v2597_v25 = vmax.f32 %v2519_v15, 0.0  ;;  %v1536_v48 = vpop.f32.mrb[192].mxu1 }
 0x276   : > { %v2256_v28 = vpop.f32.mrb[192].mxu0  ;;  %v5610_v10 = vadd.f32 %v1536_v48, %v5885_v60  ;;  %v3817_v4 = vpop.f32.mrb[193].mxu1 }
 0x277   : > { %v5606_v35 = vpack.c.bf16 %v2597_v25, %v2596_v34  ;;  %v2435_v23 = vadd.f32 %v2256_v28, %v5440_v31  ;;  %v3923_v57 = vpop.f32.mrb[193].mxu0  ;;  %v1539_v59 = vpop.f32.mrb[194].mxu1  ;;  %v5888_v28 = vld [vmem:[#allocation26_spill] sm:$0xff] }
 0x278   : > { %v2259_v38 = vpop.f32.mrb[194].mxu0  ;;  %v5615_v58 = vadd.f32 %v1539_v59, %v5886_v55  ;;  %v3818_v49 = vpop.f32.mrb[195].mxu1 }
 0x279   : > { %v2520_v63 = vadd.f32 %v5274_v13, %v2435_v23  ;;  %v2436_v45 = vadd.f32 %v2259_v38, %v5449_v62  ;;  %v3924_v3 = vpop.f32.mrb[195].mxu0 }
 0x27a   : > { %v5889_v3 = vld [vmem:[#allocation27_spill] sm:$0xff] }
 0x27b   : > { %v2521_v21 = vadd.f32 %v5274_v13, %v2436_v45  ;;  %v2598_v24 = vmax.f32 %v2520_v63, 0.0 }
 0x27d   : > { %v2599_v31 = vmax.f32 %v2521_v21, 0.0  ;;  %v1544_v7 = vpop.f32.mrb[196].mxu1 }
 0x27e   : > { %v2264_v33 = vpop.f32.mrb[196].mxu0  ;;  %v5622_v5 = vadd.f32 %v1544_v7, %v5887_v26  ;;  %v3821_v62 = vpop.f32.mrb[197].mxu1  ;;  %v5890_v7 = vld [vmem:[#allocation28_spill] sm:$0xff] }
 0x27f   : > { %v5618_v27 = vpack.c.bf16 %v2599_v31, %v2598_v24  ;;  %v2437_v37 = vadd.f32 %v2264_v33, %v5458_v41  ;;  %v3927_v61 = vpop.f32.mrb[197].mxu0  ;;  %v1547_v15 = vpop.f32.mrb[198].mxu1 }
 0x280   : > { %v2267_v12 = vpop.f32.mrb[198].mxu0  ;;  %v5627_v48 = vadd.f32 %v1547_v15, %v5888_v28  ;;  %v3822_v23 = vpop.f32.mrb[199].mxu1  ;;  %v5891_v28 = vld [vmem:[#allocation29_spill] sm:$0xff] }
 0x281   : > { %v2522_v53 = vadd.f32 %v5274_v13, %v2437_v37  ;;  %v2438_v34 = vadd.f32 %v2267_v12, %v5464_v17  ;;  %v3928_v25 = vpop.f32.mrb[199].mxu0 }
 0x283   : > { %v2523_v57 = vadd.f32 %v5274_v13, %v2438_v34  ;;  %v2600_v60 = vmax.f32 %v2522_v53, 0.0 }
 0x285   : > { %v2601_v41 = vmax.f32 %v2523_v57, 0.0  ;;  %v1552_v63 = vpop.f32.mrb[200].mxu1 }
 0x286   : > { %v2272_v4 = vpop.f32.mrb[200].mxu0  ;;  %v5634_v55 = vadd.f32 %v1552_v63, %v5889_v3  ;;  %v3825_v17 = vpop.f32.mrb[201].mxu1 }
 0x287   : > { %v5630_v38 = vpack.c.bf16 %v2601_v41, %v2600_v60  ;;  %v2439_v59 = vadd.f32 %v2272_v4, %v5473_v32  ;;  %v3931_v45 = vpop.f32.mrb[201].mxu0  ;;  %v1555_v24 = vpop.f32.mrb[202].mxu1  ;;  %v5649_v60 = vld [vmem:[%s5817_s2] ss:$0 sm:$0xff] }
 0x288   : > { %v2275_v49 = vpop.f32.mrb[202].mxu0  ;;  %v5639_v37 = vadd.f32 %v1555_v24, %v5890_v7  ;;  %v3826_v61 = vpop.f32.mrb[203].mxu1 }
 0x289   : > { %v2524_v21 = vadd.f32 %v5274_v13, %v2439_v59  ;;  %v2440_v31 = vadd.f32 %v2275_v49, %v5478_v18  ;;  %v3932_v33 = vpop.f32.mrb[203].mxu0 }
 0x28b   : > { %v2525_v26 = vadd.f32 %v5274_v13, %v2440_v31  ;;  %v2602_v62 = vmax.f32 %v2524_v21, 0.0 }
 0x28d   : > { %v2603_v32 = vmax.f32 %v2525_v26, 0.0  ;;  %v1560_v53 = vpop.f32.mrb[204].mxu1 }
 0x28e   : > { %v2280_v12 = vpop.f32.mrb[204].mxu0  ;;  %v5644_v23 = vadd.f32 %v1560_v53, %v5891_v28  ;;  %v3829_v57 = vpop.f32.mrb[205].mxu1 }
 0x28f   : > { %v2441_v15 = vadd.f32 %v2280_v12, %v5485_v16  ;;  %v3935_v34 = vpop.f32.mrb[205].mxu0  ;;  %v4072_v25 = vpack.c.bf16 %v2603_v32, %v2602_v62  ;;  %v1563_v41 = vpop.f32.mrb[206].mxu1  ;;  %v5892_v16 = vld [vmem:[#allocation30_spill] sm:$0xff] }
 0x290   : > { %v2283_v18 = vpop.f32.mrb[206].mxu0  ;;  %v5654_v59 = vadd.f32 %v1563_v41, %v5892_v16  ;;  %v3830_v45 = vpop.f32.mrb[207].mxu1 }
 0x291   : > { %v2526_v13 = vadd.f32 %v5649_v60, %v2441_v15  ;;  %v2442_v4 = vadd.f32 %v2283_v18, %v5490_v9  ;;  %4073 = vmatprep.subr.bf16.mxu1 %v4072_v25  ;;  %v3936_v63 = vpop.f32.mrb[207].mxu0 }
 0x292   : > { %4075 = vmatpush3.bf16.msra.mxu1 %v5546_v42 }
 0x293   : > { %v2527_v3 = vadd.f32 %v5649_v60, %v2442_v4  ;;  %v2604_v17 = vmax.f32 %v2526_v13, 0.0 }
 0x295   : > { %v2605_v49 = vmax.f32 %v2527_v3, 0.0 }
 0x296   : > { %v2288_v21 = vpop.f32.mrb[208].mxu0 }
 0x297   : > { %v2443_v24 = vadd.f32 %v2288_v21, %v5496_v46  ;;  %v3939_v31 = vpop.f32.mrb[209].mxu0  ;;  %v4076_v33 = vpack.c.bf16 %v2605_v49, %v2604_v17 }
 0x298   : > { %v2291_v7 = vpop.f32.mrb[210].mxu0 }
 0x299   : > { %v2528_v9 = vadd.f32 %v5649_v60, %v2443_v24  ;;  %v2444_v61 = vadd.f32 %v2291_v7, %v5501_v51  ;;  %4077 = vmatprep.subr.bf16.mxu1 %v4076_v33  ;;  %v3940_v26 = vpop.f32.mrb[211].mxu0 }
 0x29a   : > { %4079 = vmatpush3.bf16.msra.mxu1 %v5558_v20 }
 0x29b   : > { %v2529_v42 = vadd.f32 %v5649_v60, %v2444_v61  ;;  %v2606_v62 = vmax.f32 %v2528_v9, 0.0 }
 0x29d   : > { %v2607_v32 = vmax.f32 %v2529_v42, 0.0 }
 0x29e   : > { %v2296_v12 = vpop.f32.mrb[212].mxu0 }
 0x29f   : > { %v2445_v53 = vadd.f32 %v2296_v12, %v5507_v6  ;;  %v3943_v15 = vpop.f32.mrb[213].mxu0  ;;  %v4080_v46 = vpack.c.bf16 %v2607_v32, %v2606_v62 }
 0x2a0   : > { %v2299_v34 = vpop.f32.mrb[214].mxu0 }
 0x2a1   : > { %v2530_v25 = vadd.f32 %v5649_v60, %v2445_v53  ;;  %v2446_v28 = vadd.f32 %v2299_v34, %v5512_v8  ;;  %4081 = vmatprep.subr.bf16.mxu1 %v4080_v46  ;;  %v3944_v51 = vpop.f32.mrb[215].mxu0 }
 0x2a2   : > { %4083 = vmatpush3.bf16.msra.mxu1 %v5570_v44 }
 0x2a3   : > { %v2531_v20 = vadd.f32 %v5649_v60, %v2446_v28  ;;  %v2608_v57 = vmax.f32 %v2530_v25, 0.0 }
 0x2a5   : > { %v2609_v18 = vmax.f32 %v2531_v20, 0.0 }
 0x2a6   : > { %v2304_v13 = vpop.f32.mrb[216].mxu0 }
 0x2a7   : > { %v2447_v41 = vadd.f32 %v2304_v13, %v5518_v30  ;;  %v3947_v4 = vpop.f32.mrb[217].mxu0  ;;  %v4084_v6 = vpack.c.bf16 %v2609_v18, %v2608_v57 }
 0x2a8   : > { %v2307_v63 = vpop.f32.mrb[218].mxu0 }
 0x2a9   : > { %v2532_v16 = vadd.f32 %v5649_v60, %v2447_v41  ;;  %v2448_v45 = vadd.f32 %v2307_v63, %v5523_v36  ;;  %4085 = vmatprep.subr.bf16.mxu1 %v4084_v6  ;;  %v3948_v8 = vpop.f32.mrb[219].mxu0 }
 0x2aa   : > { %4087 = vmatpush3.bf16.msra.mxu1 %v5582_v54  ;;  %v4352_v8 = vmov 0.0|0.0  }
 0x2ab   : > { %v2533_v44 = vadd.f32 %v5649_v60, %v2448_v45  ;;  %v2610_v3 = vmax.f32 %v2532_v16, 0.0 }
 0x2ad   : > { %v2611_v17 = vmax.f32 %v2533_v44, 0.0 }
 0x2ae   : > { %v2312_v49 = vpop.f32.mrb[220].mxu0 }
 0x2af   : > { %v2449_v21 = vadd.f32 %v2312_v49, %v5529_v52  ;;  %v3951_v24 = vpop.f32.mrb[221].mxu0  ;;  %v4088_v30 = vpack.c.bf16 %v2611_v17, %v2610_v3 }
 0x2b0   : > { %v2315_v31 = vpop.f32.mrb[222].mxu0 }
 0x2b1   : > { %v2534_v33 = vadd.f32 %v5649_v60, %v2449_v21  ;;  %v2450_v7 = vadd.f32 %v2315_v31, %v5536_v43  ;;  %4089 = vmatprep.subr.bf16.mxu1 %v4088_v30  ;;  %v3952_v36 = vpop.f32.mrb[223].mxu0 }
 0x2b2   : > { %4091 = vmatpush3.bf16.msra.mxu1 %v5594_v1 }
 0x2b3   : > { %v2535_v54 = vadd.f32 %v5649_v60, %v2450_v7  ;;  %v2612_v9 = vmax.f32 %v2534_v33, 0.0 }
 0x2b5   : > { %v2613_v61 = vmax.f32 %v2535_v54, 0.0 }
 0x2b6   : > { %v2320_v26 = vpop.f32.mrb[224].mxu0 }
 0x2b7   : > { %v2451_v42 = vadd.f32 %v2320_v26, %v5550_v50  ;;  %v3955_v62 = vpop.f32.mrb[225].mxu0  ;;  %v4092_v52 = vpack.c.bf16 %v2613_v61, %v2612_v9 }
 0x2b8   : > { %v2323_v32 = vpop.f32.mrb[226].mxu0 }
 0x2b9   : > { %v2536_v12 = vadd.f32 %v5649_v60, %v2451_v42  ;;  %v2452_v53 = vadd.f32 %v2323_v32, %v5555_v14  ;;  %4093 = vmatprep.subr.bf16.mxu1 %v4092_v52  ;;  %v3956_v43 = vpop.f32.mrb[227].mxu0 }
 0x2ba   : > { %4095 = vmatpush3.bf16.msra.mxu1 %v5606_v35 }
 0x2bb   : > { %v2537_v1 = vadd.f32 %v5649_v60, %v2452_v53  ;;  %v2614_v15 = vmax.f32 %v2536_v12, 0.0 }
 0x2bd   : > { %v2615_v46 = vmax.f32 %v2537_v1, 0.0 }
 0x2be   : > { %v2328_v34 = vpop.f32.mrb[228].mxu0 }
 0x2bf   : > { %v2453_v25 = vadd.f32 %v2328_v34, %v5562_v11  ;;  %v3959_v28 = vpop.f32.mrb[229].mxu0  ;;  %v4096_v50 = vpack.c.bf16 %v2615_v46, %v2614_v15 }
 0x2c0   : > { %v2331_v51 = vpop.f32.mrb[230].mxu0 }
 0x2c1   : > { %v2538_v20 = vadd.f32 %v5649_v60, %v2453_v25  ;;  %v2454_v57 = vadd.f32 %v2331_v51, %v5567_v47  ;;  %4097 = vmatprep.subr.bf16.mxu1 %v4096_v50  ;;  %v3960_v14 = vpop.f32.mrb[231].mxu0 }
 0x2c2   : > { %4099 = vmatpush3.bf16.msra.mxu1 %v5618_v27 }
 0x2c3   : > { %v2539_v35 = vadd.f32 %v5649_v60, %v2454_v57  ;;  %v2616_v18 = vmax.f32 %v2538_v20, 0.0 }
 0x2c5   : > { %v2617_v13 = vmax.f32 %v2539_v35, 0.0 }
 0x2c6   : > { %v2336_v41 = vpop.f32.mrb[232].mxu0 }
 0x2c7   : > { %v2455_v4 = vadd.f32 %v2336_v41, %v5574_v39  ;;  %v3963_v6 = vpop.f32.mrb[233].mxu0  ;;  %v4100_v11 = vpack.c.bf16 %v2617_v13, %v2616_v18 }
 0x2c8   : > { %v2339_v63 = vpop.f32.mrb[234].mxu0 }
 0x2c9   : > { %v2540_v16 = vadd.f32 %v5649_v60, %v2455_v4  ;;  %v2456_v45 = vadd.f32 %v2339_v63, %v5579_v56  ;;  %4101 = vmatprep.subr.bf16.mxu1 %v4100_v11  ;;  %v3964_v47 = vpop.f32.mrb[235].mxu0 }
 0x2ca   : > { %4103 = vmatpush3.bf16.msra.mxu1 %v5630_v38 }
 0x2cb   : > { %v2541_v27 = vadd.f32 %v5649_v60, %v2456_v45  ;;  %4104 = vmatprep.subr.bf16.mxu1 %v4352_v8  ;;  %v2618_v44 = vmax.f32 %v2540_v16, 0.0 }
 0x2cd   : > { %v2619_v3 = vmax.f32 %v2541_v27, 0.0  ;;  %2805 = vmatmul.mubr.f32.vlgmr.msra.gmra.mrb[210].mxu1 %v5540_v0 }
 0x2ce   : > { %v2344_v39 = vpop.f32.mrb[236].mxu0  ;;  %4017 = vmatprep.mubr.msk.f32.mxu1 %vm4350_vm2, %v5852_v19 }
 0x2cf   : > { %v4105_v17 = vpack.c.bf16 %v2619_v3, %v2618_v44  ;;  %v2457_v56 = vadd.f32 %v2344_v39, %v5586_v2  ;;  %v3967_v49 = vpop.f32.mrb[237].mxu0 }
 0x2d0   : > { %v2347_v21 = vpop.f32.mrb[238].mxu0 }
 0x2d1   : > { %v2542_v38 = vadd.f32 %v5649_v60, %v2457_v56  ;;  %v2458_v24 = vadd.f32 %v2347_v21, %v5591_v29  ;;  %4106 = vmatpush3.bf16.msra.mxu1 %v4105_v17  ;;  %v3968_v30 = vpop.f32.mrb[239].mxu0 }
 0x2d2   : > { %4107 = vmatprep.subr.bf16.mxu1 %v4352_v8 }
 0x2d3   : > { %v2543_v31 = vadd.f32 %v5649_v60, %v2458_v24  ;;  %v2620_v0 = vmax.f32 %v2542_v38, 0.0 }
 0x2d5   : > { %v2621_v33 = vmax.f32 %v2543_v31, 0.0  ;;  %v4262_v31 = vld [vmem:[%s5819_s4 + $0x18] sm:$0xff]  }
 0x2d6   : > { %v2352_v7 = vpop.f32.mrb[240].mxu0 }
 0x2d7   : > { %v4108_v36 = vpack.c.bf16 %v2621_v33, %v2620_v0  ;;  %v2459_v54 = vadd.f32 %v2352_v7, %v5598_v40  ;;  %v3971_v9 = vpop.f32.mrb[241].mxu0  ;;  %v4263_v0 = vld [vmem:[%s5819_s4 + $0x20] sm:$0xff]   ;;  %v4264_v33 = vld [vmem:[%s5819_s4 + $0x28] sm:$0xff]  }
 0x2d8   : > { %v2355_v2 = vpop.f32.mrb[242].mxu0  ;;  %v4265_v9 = vld [vmem:[%s5819_s4 + $0x30] sm:$0xff]  }
 0x2d9   : > { %v2544_v61 = vadd.f32 %v5649_v60, %v2459_v54  ;;  %v2460_v26 = vadd.f32 %v2355_v2, %v5603_v22  ;;  %4109 = vmatpush3.bf16.msra.mxu1 %v4108_v36  ;;  %v3972_v29 = vpop.f32.mrb[243].mxu0  ;;  %v4266_v2 = vld [vmem:[%s5819_s4 + $0x38] sm:$0xff]  }
 0x2da   : > { %4110 = vmatprep.subr.bf16.mxu1 %v4352_v8 }
 0x2db   : > { %v2545_v42 = vadd.f32 %v5649_v60, %v2460_v26  ;;  %v2622_v62 = vmax.f32 %v2544_v61, 0.0 }
 0x2dd   : > { %v2623_v52 = vmax.f32 %v2545_v42, 0.0 }
 0x2de   : > { %v2360_v32 = vpop.f32.mrb[244].mxu0 }
 0x2df   : > { %v4111_v12 = vpack.c.bf16 %v2623_v52, %v2622_v62  ;;  %v2461_v53 = vadd.f32 %v2360_v32, %v5610_v10  ;;  %v3975_v43 = vpop.f32.mrb[245].mxu0 }
 0x2e0   : > { %v2363_v40 = vpop.f32.mrb[246].mxu0 }
 0x2e1   : > { %v2546_v1 = vadd.f32 %v5649_v60, %v2461_v53  ;;  %v2462_v15 = vadd.f32 %v2363_v40, %v5615_v58  ;;  %4112 = vmatpush3.bf16.msra.mxu1 %v4111_v12  ;;  %v3976_v22 = vpop.f32.mrb[247].mxu0 }
 0x2e2   : > { %4113 = vmatprep.subr.bf16.mxu1 %v4352_v8 }
 0x2e3   : > { %v2547_v46 = vadd.f32 %v5649_v60, %v2462_v15  ;;  %v2624_v34 = vmax.f32 %v2546_v1, 0.0 }
 0x2e5   : > { %v2625_v25 = vmax.f32 %v2547_v46, 0.0 }
 0x2e6   : > { %v2368_v28 = vpop.f32.mrb[248].mxu0 }
 0x2e7   : > { %v4114_v50 = vpack.c.bf16 %v2625_v25, %v2624_v34  ;;  %v2463_v51 = vadd.f32 %v2368_v28, %v5622_v5  ;;  %v3979_v20 = vpop.f32.mrb[249].mxu0 }
 0x2e8   : > { %v2371_v10 = vpop.f32.mrb[250].mxu0 }
 0x2e9   : > { %v2548_v57 = vadd.f32 %v5649_v60, %v2463_v51  ;;  %v2464_v14 = vadd.f32 %v2371_v10, %v5627_v48  ;;  %4115 = vmatpush3.bf16.msra.mxu1 %v4114_v50  ;;  %v3980_v58 = vpop.f32.mrb[251].mxu0 }
 0x2ea   : > { %4116 = vmatprep.subr.bf16.mxu1 %v4352_v8 }
 0x2eb   : > { %v2549_v35 = vadd.f32 %v5649_v60, %v2464_v14  ;;  %v2626_v18 = vmax.f32 %v2548_v57, 0.0 }
 0x2ed   : > { %v2627_v13 = vmax.f32 %v2549_v35, 0.0 }
 0x2ee   : > { %v2376_v41 = vpop.f32.mrb[252].mxu0 }
 0x2ef   : > { %v4117_v4 = vpack.c.bf16 %v2627_v13, %v2626_v18  ;;  %v2465_v6 = vadd.f32 %v2376_v41, %v5634_v55  ;;  %v3983_v11 = vpop.f32.mrb[253].mxu0 }
 0x2f0   : > { %v2379_v5 = vpop.f32.mrb[254].mxu0 }
 0x2f1   : > { %v2550_v63 = vadd.f32 %v5649_v60, %v2465_v6  ;;  %v2466_v16 = vadd.f32 %v2379_v5, %v5639_v37  ;;  %4118 = vmatpush3.bf16.msra.mxu1 %v4117_v4  ;;  %v3984_v48 = vpop.f32.mrb[255].mxu0 }
 0x2f2   : > { %4119 = vmatprep.subr.bf16.mxu1 %v4352_v8 }
 0x2f3   : > { %v2551_v45 = vadd.f32 %v5649_v60, %v2466_v16  ;;  %v2628_v47 = vmax.f32 %v2550_v63, 0.0 }
 0x2f5   : > { %v2629_v27 = vmax.f32 %v2551_v45, 0.0 }
 0x2f6   : > { %v2384_v44 = vpop.f32.mrb[0].mxu0 }
 0x2f7   : > { %v4120_v3 = vpack.c.bf16 %v2629_v27, %v2628_v47  ;;  %v2467_v39 = vadd.f32 %v2384_v44, %v5644_v23  ;;  %v3987_v17 = vpop.f32.mrb[1].mxu0  ;;  %v3284_v23 = vld.sshfl [vmem:[%s5818_s3 + $0x8] sm:$0x3 pattern:$0x76325410] }
 0x2f8   : > { %v2387_v55 = vpop.f32.mrb[2].mxu0 }
 0x2f9   : > { %v2552_v56 = vadd.f32 %v5649_v60, %v2467_v39  ;;  %v2468_v49 = vadd.f32 %v2387_v55, %v5654_v59  ;;  %4121 = vmatpush3.bf16.msra.mxu1 %v4120_v3  ;;  %v3988_v37 = vpop.f32.mrb[3].mxu0  ;;  %v4259_v59 = vld [vmem:[%s5819_s4] sm:$0xff]  }
 0x2fa   : > { %4122 = vmatprep.subr.bf16.mxu1 %v4352_v8  ;;  %v4261_v8 = vld [vmem:[%s5819_s4 + $0x10] sm:$0xff]  }
 0x2fb   : > { %v2553_v21 = vadd.f32 %v5649_v60, %v2468_v49  ;;  %v2630_v38 = vmax.f32 %v2552_v56, 0.0  ;;  %v4260_v60 = vld [vmem:[%s5819_s4 + $0x8] sm:$0xff]  }
 0x2fd   : > { %v2631_v24 = vmax.f32 %v2553_v21, 0.0 }
 0x2ff   : > { %v4123_v30 = vpack.c.bf16 %v2631_v24, %v2630_v38 }
 0x301   : > { %4125 = vmatpush3.bf16.msk.msra.mxu1 %vm4124_vm7, %v4123_v30 }
 0x302   : > { %4020 = vmatprep.subr.bf16.mxu1 %v5852_v19 }
 0x304   : > { %4018 = vmatmul.mubr.msk.f32.vlgmr.msra.gmra.mrb[212].mxu1 %vm2664_vm8, %v3284_v23 }
 0x305   : > { %4021 = vmatpush3.bf16.msra.mxu1 %v4259_v59  ;;  %4036 = vmatprep.mubr.msk.bf16.mxu1 %vm4350_vm2, %v5852_v19 }
 0x306   : > { %4022 = vmatprep.subr.bf16.mxu1 %v5852_v19 }
 0x309   : > { %4023 = vmatpush3.bf16.msra.mxu1 %v4260_v60 }
 0x30a   : > { %4024 = vmatprep.subr.bf16.mxu1 %v5852_v19 }
 0x30d   : > { %4025 = vmatpush3.bf16.msra.mxu1 %v4261_v8 }
 0x30e   : > { %4026 = vmatprep.subr.bf16.mxu1 %v5852_v19 }
 0x311   : > { %4027 = vmatpush3.bf16.msra.mxu1 %v4262_v31 }
 0x312   : > { %4028 = vmatprep.subr.bf16.mxu1 %v5852_v19 }
 0x315   : > { %4029 = vmatpush3.bf16.msra.mxu1 %v4263_v0 }
 0x316   : > { %4030 = vmatprep.subr.bf16.mxu1 %v5852_v19 }
 0x319   : > { %4031 = vmatpush3.bf16.msra.mxu1 %v4264_v33 }
 0x31a   : > { %4032 = vmatprep.subr.bf16.mxu1 %v5852_v19 }
 0x31d   : > { %4033 = vmatpush3.bf16.msra.mxu1 %v4265_v9 }
 0x31e   : > { %4034 = vmatprep.subr.bf16.mxu1 %v5852_v19  ;;  %v3287_v19 = vld [vmem:[%s5820_s5] ss:$0 sm:$0xff] }
 0x320   : > { %v3453_v7 = vpop.f32.mrb[208].mxu1 }
 0x321   : > { %v3454_v36 = vpop.f32.mrb[209].mxu1  ;;  %4035 = vmatpush3.bf16.msra.mxu1 %v4266_v2 }
 0x322   : > { %v3455_v54 = vadd.f32 %v3454_v36, %v3453_v7 }
 0x3a0   : > { %v3488_v61 = vpop.f32.mrb[210].mxu1 }
 0x3a1   : > { %v3489_v26 = vpop.f32.mrb[211].mxu1 }
 0x3a2   : > { %v3490_v29 = vadd.f32 %v3489_v26, %v3488_v61 }
 0x3a4   : > { %v2807_v42 = vadd.f32 %v3490_v29, %v3455_v54 }
 0x3d7   : > { %v2876_v62 = vpop.f32.mrb[212].mxu1 }
 0x3d8   : > { %v2877_v52 = vadd.f32 %v2876_v62, %v2807_v42  ;;  %v4019_v32 = vpop.f32.mrb[213].mxu1 }
 0x3da   : > { %v2880_v12 = vpack.c.bf16 %v2877_v52, %v2877_v52 }
 0x3dc   : > { %4037 = vmatmul.mubr.bf16.vlgmr.msra.gmra.mrb[216].mxu1 %v2880_v12 }
 0x4af   : > { %v2986_v53 = vpop.f32.mrb[216].mxu1 }
 0x4b0   : > { %v2987_v43 = vadd.f32 %v3287_v19, %v2986_v53  ;;  %v4038_v40 = vpop.f32.mrb[217].mxu1 }
 0x4b1   : > { %v2989_v1 = vpop.f32.mrb[218].mxu1 }
 0x4b2   : > { %v3296_v15 = vmul.f32 -1.442695, %v2987_v43  ;;  %v4039_v22 = vpop.f32.mrb[219].mxu1 }
 0x4b4   : > { %4267 = vpow2.f32 %v3296_v15 }
 0x4be   : > { %v4268_v46 = vpop.eup %4267 }
 0x4bf   : > { %v2995_v34 = vadd.f32 1.0, %v4268_v46 }
 0x4c1   : > { %4269 = vrcp.f32 %v2995_v34 }
 0x4cb   : > { %v4270_v25 = vpop.eup %4269 }
 0x4cc   : > { %2998 = vst [vmem:[%s244_s19] sm:$0x3] %v4270_v25 }
 0x4cd   : > { %4297 = shalt.err (!%p4294_p3)
}
 0x4ce   : > { %s4298_s13 = scalar_lea.hbm %s5773_s29, 32  ;;  %s4302_s16 = scalar_lea.hbm %s5821_s6, 64 }
 0x4cf   : > { %p4299_p4 = scmp.ne.s32.totalorder %s5773_s29, %s4298_s13  ;;  %p4303_p9 = scmp.lt.u32.totalorder %s5773_s29, %s5821_s6 }
 0x4d0   : > { %p4304_p10 = scmp.lt.u32.totalorder %s4302_s16, %s4298_s13  ;;  %p4306_p12 = scmp.lt.u32.totalorder %s4298_s13, %s5773_s29 }
 0x4d1   : > { %p4300_p7 = pnand %p4299_p4, %p4428_p5 }
 0x4d2   : > { %p4305_p11 = por %p4304_p10, %p4303_p9 }
 0x4d3   : > { %p4301_p8 = pneg %p4300_p7 }
 0x4d4   : > { %p4307_p13 = por %p4306_p12, %p4305_p11 }
 0x4d6   : > { %p4308_p0 = pnand %p4307_p13, %p4301_p8 }
 0x4d8   : > { %4311 = shalt.err (!%p4308_p0)
}
 0x4d9   : > { %4129 = dma.vmem_to_hbm [thread:$0]  (%p4428_p5), %s5775_s20, 32, %s5773_s29, %s3000_s9  }
 0x4da PF: > { %p4135_p1 = scmp.ge.s32.totalorder %s4346_s24, 2  ;;  %s3025_s19 = sand.u32 1, %s4334_s21  }
 0x4db   : > { %s3026_s26 = scalar_lea.sflag [#allocation3], %s3025_s19 }
 0x4dc   : > { %p4132_p2 = pnand %p4135_p1, %p4432_p6 }
 0x4de   : > { %4329 = dma.done.wait (!%p4132_p2), %s3026_s26, 32  }
 0x4df   : > { %4331 = vsyncadd (!%p4132_p2), %s3026_s26, 4294967264  ;;  %p16_p3 = scmp.ge.s32.totalorder %s4415_s27, 4   ;;  %s5893_s21 = smov %s4338_s22 }
 0x4e0   : > { %s5894_s22 = smov %s4342_s23  ;;  %s5895_s23 = smov %s4426_s30 }
 0x4e1   : > { %s5896_s24 = smov %s4415_s27  ;;  %18 = sbr.rel (!%p16_p3) target bundleno = 3 (0x3), region = 81 }
 0x4e8   :  { %3031 = vsyncpa [#allocation3], 1 }
 0x4e9   :  { %3033 = vsyncpa [#allocation3 + $0x1], 1 }

</bundles_post_ra>
